<compile_context>
chip_gen: v6e
topology: v6e:2x2x1
jax: 0.10.0
libtpu: 0.0.40
codegen_flags: <defaults>
</compile_context>

<pallas_src>
import functools

import numpy as np
import jax
import jax.numpy as jnp
from jax.experimental import pallas as pl
from jax.experimental.pallas import tpu as pltpu

_BN_EPS = 1e-5


def _decoder_kernel(x_ref, skip_ref, upmat_ref, par_ref, msk_ref,
                    wup_ref, bup_ref, w1_ref, b1_ref, w2_ref, b2_ref,
                    gamma_ref, beta_ref,
                    out_ref, patch1_ref, patch2_ref, *, Cout, Wo, L):
    # Precomputed constants (loaded once; all further slicing is on register values).
    par = par_ref[...]                                   # (4, L) parity masks
    msk = msk_ref[...]                                   # (9, L) border masks

    # ---- ConvTranspose2d(k=2, s=2): NN-upsample gather (MXU) + per-parity taps ----
    x_up = jnp.dot(x_ref[...], upmat_ref[...],
                   preferred_element_type=jnp.float32)   # (Cin, L)
    planes = jnp.dot(wup_ref[...], x_up,
                     preferred_element_type=jnp.float32)  # (4*Cout, L)
    up = jnp.zeros((Cout, L), jnp.float32)
    for tap in range(4):                                  # pixel shuffle in-register
        up = up + par[tap:tap + 1, :] * planes[tap * Cout:(tap + 1) * Cout, :]
    up = up + bup_ref[...]

    # ---- channel concat with the skip connection (stays in VMEM/vregs) ----
    cat = jnp.concatenate([up, skip_ref[...]], axis=0)    # (2*Cout, L)

    def conv3x3(src, w_flat, b_col, patches_ref):
        # im2col patch matrix via lane rotations + precomputed masks, assembled
        # directly in VMEM scratch with static sublane-aligned slice stores,
        # then a single MXU matmul.
        C = src.shape[0]
        for t in range(9):
            dy, dx = t // 3 - 1, t % 3 - 1
            shift = (-(dy * Wo + dx)) % L
            shifted = src if shift == 0 else pltpu.roll(src, shift=shift, axis=1)
            patches_ref[t * C:(t + 1) * C, :] = shifted * msk[t:t + 1, :]
        return jnp.dot(w_flat, patches_ref[...],
                       preferred_element_type=jnp.float32) + b_col

    y1 = jnp.maximum(conv3x3(cat, w1_ref[...], b1_ref[...], patch1_ref), 0.0)
    y2 = jnp.maximum(conv3x3(y1, w2_ref[...], b2_ref[...], patch2_ref), 0.0)

    # ---- BatchNorm2d (training-mode batch stats over N*Ho*Wo, biased variance) ----
    cnt = float(L)
    mean = jnp.sum(y2, axis=1, keepdims=True) / cnt       # (Cout, 1)
    centered = y2 - mean
    var = jnp.sum(centered * centered, axis=1, keepdims=True) / cnt
    scale = jax.lax.rsqrt(var + _BN_EPS) * gamma_ref[...]
    out_ref[...] = centered * scale + beta_ref[...]


# --------------------------------- wrapper ---------------------------------
def decoder_forward(params, inputs_nchw, skip_nchw):
    N, Cin, H, W = inputs_nchw.shape
    Cout = params["w_up"].shape[1]
    Ho, Wo = 2 * H, 2 * W
    S = Ho * Wo
    L = N * S                                             # batch*spatial lane axis

    # --- host-precomputed constant index / mask tensors (never rebuilt in-kernel) ---
    g = np.arange(L)
    p = (g % S) // Wo                                     # within-image output row
    q = (g % S) % Wo                                      # within-image output col
    n_idx = g // S
    src = n_idx * (H * W) + (p // 2) * W + (q // 2)       # source flat idx per lane
    upmat = (np.arange(N * H * W)[:, None] == src[None, :]).astype(np.float32)
    par = np.stack([((p % 2) == ki) & ((q % 2) == kj)
                    for ki in range(2) for kj in range(2)]).astype(np.float32)
    msk = np.stack([(p + dy >= 0) & (p + dy < Ho) & (q + dx >= 0) & (q + dx < Wo)
                    for dy in (-1, 0, 1) for dx in (-1, 0, 1)]).astype(np.float32)

    # --- boundary layout plumbing: channels on sublanes, batch*spatial on lanes ---
    x_flat = jnp.transpose(inputs_nchw, (1, 0, 2, 3)).reshape(Cin, N * H * W)
    skip_flat = jnp.transpose(skip_nchw, (1, 0, 2, 3)).reshape(Cout, L)

    # --- one-time weight repacks matching the in-kernel patch-row order ---
    # torch ConvTranspose2d weight (Cin, Cout, 2, 2) -> rows (tap, o), cols c
    w_up_all = jnp.transpose(params["w_up"], (2, 3, 1, 0)).reshape(4 * Cout, Cin)
    # torch Conv2d weight (O, I, 3, 3) -> (O, tap*I + i)
    w1_flat = jnp.transpose(params["w1"], (0, 2, 3, 1)).reshape(Cout, 9 * 2 * Cout)
    w2_flat = jnp.transpose(params["w2"], (0, 2, 3, 1)).reshape(Cout, 9 * Cout)
    col = lambda v: v[:, None]

    def full(shape):
        return pl.BlockSpec(shape, lambda i: (0,) * len(shape))

    kernel = functools.partial(_decoder_kernel, Cout=Cout, Wo=Wo, L=L)
    out_flat = pl.pallas_call(
        kernel,
        out_shape=jax.ShapeDtypeStruct((Cout, L), jnp.float32),
        grid=(1,),
        in_specs=[
            full((Cin, N * H * W)),        # x                (Cin, N*H*W)
            full((Cout, L)),               # skip             (Cout, L)
            full((N * H * W, L)),          # upsample 0/1 gather matrix
            full((4, L)),                  # parity masks
            full((9, L)),                  # border masks
            full((4 * Cout, Cin)),         # deconv weights
            full((Cout, 1)),               # deconv bias
            full((Cout, 9 * 2 * Cout)),    # conv1 weights
            full((Cout, 1)),               # conv1 bias
            full((Cout, 9 * Cout)),        # conv2 weights
            full((Cout, 1)),               # conv2 bias
            full((Cout, 1)),               # bn gamma
            full((Cout, 1)),               # bn beta
        ],
        out_specs=full((Cout, L)),
        scratch_shapes=[pltpu.VMEM((9 * 2 * Cout, L), jnp.float32),   # conv1 patches
                        pltpu.VMEM((9 * Cout, L), jnp.float32)],      # conv2 patches
        compiler_params=pltpu.CompilerParams(
            dimension_semantics=("arbitrary",),
            vmem_limit_bytes=32 * 1024 * 1024),
    )(x_flat, skip_flat, jnp.asarray(upmat), jnp.asarray(par), jnp.asarray(msk),
      w_up_all, col(params["b_up"]), w1_flat, col(params["b1"]),
      w2_flat, col(params["b2"]), col(params["gamma"]), col(params["beta"]))

    return jnp.transpose(out_flat.reshape(Cout, N, Ho, Wo), (1, 0, 2, 3))  # NCHW


# ------------------------- pure-JAX reference (XLA) -------------------------
def decoder_reference(params, x, skip):
    N, Cin, H, W = x.shape
    Cout = params["w_up"].shape[1]
    hi = jax.lax.Precision.HIGHEST
    # ConvTranspose2d k=2 s=2: out[n,o,2i+k,2j+l] = sum_c x[n,c,i,j] * W[c,o,k,l] + b[o]
    t = jnp.einsum("ncij,cokl->noikjl", x, params["w_up"], precision=hi)
    up = t.reshape(N, Cout, 2 * H, 2 * W) + params["b_up"][None, :, None, None]
    xcat = jnp.concatenate([up, skip], axis=1)
    dn = ("NCHW", "OIHW", "NCHW")
    y = jax.lax.conv_general_dilated(xcat, params["w1"], (1, 1), "SAME",
                                     dimension_numbers=dn, precision=hi)
    y = jnp.maximum(y + params["b1"][None, :, None, None], 0.0)
    y = jax.lax.conv_general_dilated(y, params["w2"], (1, 1), "SAME",
                                     dimension_numbers=dn, precision=hi)
    y = jnp.maximum(y + params["b2"][None, :, None, None], 0.0)
    mean = jnp.mean(y, axis=(0, 2, 3), keepdims=True)
    var = jnp.mean((y - mean) ** 2, axis=(0, 2, 3), keepdims=True)
    y = (y - mean) * jax.lax.rsqrt(var + _BN_EPS)
    return y * params["gamma"][None, :, None, None] + params["beta"][None, :, None, None]


if __name__ == "__main__":
    # Decoder(in_channel=16, out_channel=8):
    # inputs (N, Cin, H, W) = (2, 16, 8, 8), skip (N, Cout, 2H, 2W) = (2, 8, 16, 16).
    N, Cin, Cout, H, W = 2, 16, 8, 8, 8
    key = jax.random.PRNGKey(0)
    ks = jax.random.split(key, 10)
    params = {
        "w_up": jax.random.normal(ks[0], (Cin, Cout, 2, 2), jnp.float32) * 0.1,
        "b_up": jax.random.normal(ks[1], (Cout,), jnp.float32) * 0.1,
        "w1": jax.random.normal(ks[2], (Cout, 2 * Cout, 3, 3), jnp.float32) * 0.1,
        "b1": jax.random.normal(ks[3], (Cout,), jnp.float32) * 0.1,
        "w2": jax.random.normal(ks[4], (Cout, Cout, 3, 3), jnp.float32) * 0.1,
        "b2": jax.random.normal(ks[5], (Cout,), jnp.float32) * 0.1,
        "gamma": 1.0 + jax.random.normal(ks[6], (Cout,), jnp.float32) * 0.1,
        "beta": jax.random.normal(ks[7], (Cout,), jnp.float32) * 0.1,
    }
    x = jax.random.normal(ks[8], (N, Cin, H, W), jnp.float32)
    skip = jax.random.normal(ks[9], (N, Cout, 2 * H, 2 * W), jnp.float32)

    out = jax.jit(decoder_forward)(params, x, skip)
    out = jax.block_until_ready(out)

    ref = decoder_reference(params, x, skip)
    assert out.shape == (N, Cout, 2 * H, 2 * W), out.shape
    max_err = float(jnp.max(jnp.abs(out - ref)))
    assert jnp.allclose(out, ref, atol=2e-3, rtol=2e-3), f"max abs err {max_err}"
    print("KERNEL_OK")
</pallas_src>

<mosaic_0001>
module attributes {stable_mosaic.version = 11 : i64} {
  func.func @_decoder_kernel(%arg0: i32, %arg1: memref<16x128xf32, #tpu.memory_space<vmem>>, %arg2: memref<8x512xf32, #tpu.memory_space<vmem>>, %arg3: memref<128x512xf32, #tpu.memory_space<vmem>>, %arg4: memref<4x512xf32, #tpu.memory_space<vmem>>, %arg5: memref<9x512xf32, #tpu.memory_space<vmem>>, %arg6: memref<32x16xf32, #tpu.memory_space<vmem>>, %arg7: memref<8x1xf32, #tpu.memory_space<vmem>>, %arg8: memref<8x144xf32, #tpu.memory_space<vmem>>, %arg9: memref<8x1xf32, #tpu.memory_space<vmem>>, %arg10: memref<8x72xf32, #tpu.memory_space<vmem>>, %arg11: memref<8x1xf32, #tpu.memory_space<vmem>>, %arg12: memref<8x1xf32, #tpu.memory_space<vmem>>, %arg13: memref<8x1xf32, #tpu.memory_space<vmem>>, %arg14: memref<8x512xf32, #tpu.memory_space<vmem>>, %arg15: memref<144x512xf32, #tpu.memory_space<vmem>>, %arg16: memref<72x512xf32, #tpu.memory_space<vmem>>) attributes {dimension_semantics = [#tpu.dimension_semantics<arbitrary>], iteration_bounds = array<i64: 1>, scalar_prefetch = 0 : i64, scratch_operands = 2 : i64, tpu.core_type = #tpu.core_type<tc>, window_params = [{pipeline_mode = #tpu.pipeline_mode<synchronous>, transform_indices = @transform_0, window_bounds = array<i64: 16, 128>}, {pipeline_mode = #tpu.pipeline_mode<synchronous>, transform_indices = @transform_1, window_bounds = array<i64: 8, 512>}, {pipeline_mode = #tpu.pipeline_mode<synchronous>, transform_indices = @transform_2, window_bounds = array<i64: 128, 512>}, {pipeline_mode = #tpu.pipeline_mode<synchronous>, transform_indices = @transform_3, window_bounds = array<i64: 4, 512>}, {pipeline_mode = #tpu.pipeline_mode<synchronous>, transform_indices = @transform_4, window_bounds = array<i64: 9, 512>}, {pipeline_mode = #tpu.pipeline_mode<synchronous>, transform_indices = @transform_5, window_bounds = array<i64: 32, 16>}, {pipeline_mode = #tpu.pipeline_mode<synchronous>, transform_indices = @transform_6, window_bounds = array<i64: 8, 1>}, {pipeline_mode = #tpu.pipeline_mode<synchronous>, transform_indices = @transform_7, window_bounds = array<i64: 8, 144>}, {pipeline_mode = #tpu.pipeline_mode<synchronous>, transform_indices = @transform_8, window_bounds = array<i64: 8, 1>}, {pipeline_mode = #tpu.pipeline_mode<synchronous>, transform_indices = @transform_9, window_bounds = array<i64: 8, 72>}, {pipeline_mode = #tpu.pipeline_mode<synchronous>, transform_indices = @transform_10, window_bounds = array<i64: 8, 1>}, {pipeline_mode = #tpu.pipeline_mode<synchronous>, transform_indices = @transform_11, window_bounds = array<i64: 8, 1>}, {pipeline_mode = #tpu.pipeline_mode<synchronous>, transform_indices = @transform_12, window_bounds = array<i64: 8, 1>}, {pipeline_mode = #tpu.pipeline_mode<synchronous>, transform_indices = @transform_13, window_bounds = array<i64: 8, 512>}]} {
    %c0 = arith.constant 0 : index
    %c0_0 = arith.constant 0 : index
    %0 = vector.load %arg4[%c0, %c0_0] : memref<4x512xf32, #tpu.memory_space<vmem>>, vector<4x512xf32>
    %c0_1 = arith.constant 0 : index
    %c0_2 = arith.constant 0 : index
    %1 = vector.load %arg5[%c0_1, %c0_2] : memref<9x512xf32, #tpu.memory_space<vmem>>, vector<9x512xf32>
    %c0_3 = arith.constant 0 : index
    %c0_4 = arith.constant 0 : index
    %2 = vector.load %arg1[%c0_3, %c0_4] : memref<16x128xf32, #tpu.memory_space<vmem>>, vector<16x128xf32>
    %c0_5 = arith.constant 0 : index
    %c0_6 = arith.constant 0 : index
    %3 = vector.load %arg3[%c0_5, %c0_6] : memref<128x512xf32, #tpu.memory_space<vmem>>, vector<128x512xf32>
    %cst = arith.constant dense<0.000000e+00> : vector<16x512xf32>
    %4 = tpu.matmul %2, %3, %cst {dimension_numbers = #tpu.dot_dimension_numbers<[1], [0], [0], [1], [0, 0, 1, 1], [], []>} : vector<16x128xf32>, vector<128x512xf32>, vector<16x512xf32> -> vector<16x512xf32>
    %c0_7 = arith.constant 0 : index
    %c0_8 = arith.constant 0 : index
    %5 = vector.load %arg6[%c0_7, %c0_8] : memref<32x16xf32, #tpu.memory_space<vmem>>, vector<32x16xf32>
    %cst_9 = arith.constant dense<0.000000e+00> : vector<32x512xf32>
    %6 = tpu.matmul %5, %4, %cst_9 {dimension_numbers = #tpu.dot_dimension_numbers<[1], [0], [0], [1], [0, 0, 1, 1], [], []>} : vector<32x16xf32>, vector<16x512xf32>, vector<32x512xf32> -> vector<32x512xf32>
    %cst_10 = arith.constant 0.000000e+00 : f32
    %7 = vector.broadcast %cst_10 : f32 to vector<8x512xf32>
    %8 = vector.extract_strided_slice %0 {offsets = [0, 0], sizes = [1, 512], strides = [1, 1]} : vector<4x512xf32> to vector<1x512xf32>
    %9 = vector.extract_strided_slice %6 {offsets = [0, 0], sizes = [8, 512], strides = [1, 1]} : vector<32x512xf32> to vector<8x512xf32>
    %10 = vector.broadcast %8 : vector<1x512xf32> to vector<8x512xf32>
    %11 = arith.mulf %10, %9 : vector<8x512xf32>
    %12 = arith.addf %7, %11 : vector<8x512xf32>
    %13 = vector.extract_strided_slice %0 {offsets = [1, 0], sizes = [1, 512], strides = [1, 1]} : vector<4x512xf32> to vector<1x512xf32>
    %14 = vector.extract_strided_slice %6 {offsets = [8, 0], sizes = [8, 512], strides = [1, 1]} : vector<32x512xf32> to vector<8x512xf32>
    %15 = vector.broadcast %13 : vector<1x512xf32> to vector<8x512xf32>
    %16 = arith.mulf %15, %14 : vector<8x512xf32>
    %17 = arith.addf %12, %16 : vector<8x512xf32>
    %18 = vector.extract_strided_slice %0 {offsets = [2, 0], sizes = [1, 512], strides = [1, 1]} : vector<4x512xf32> to vector<1x512xf32>
    %19 = vector.extract_strided_slice %6 {offsets = [16, 0], sizes = [8, 512], strides = [1, 1]} : vector<32x512xf32> to vector<8x512xf32>
    %20 = vector.broadcast %18 : vector<1x512xf32> to vector<8x512xf32>
    %21 = arith.mulf %20, %19 : vector<8x512xf32>
    %22 = arith.addf %17, %21 : vector<8x512xf32>
    %23 = vector.extract_strided_slice %0 {offsets = [3, 0], sizes = [1, 512], strides = [1, 1]} : vector<4x512xf32> to vector<1x512xf32>
    %24 = vector.extract_strided_slice %6 {offsets = [24, 0], sizes = [8, 512], strides = [1, 1]} : vector<32x512xf32> to vector<8x512xf32>
    %25 = vector.broadcast %23 : vector<1x512xf32> to vector<8x512xf32>
    %26 = arith.mulf %25, %24 : vector<8x512xf32>
    %27 = arith.addf %22, %26 : vector<8x512xf32>
    %c0_11 = arith.constant 0 : index
    %c0_12 = arith.constant 0 : index
    %28 = vector.load %arg7[%c0_11, %c0_12] : memref<8x1xf32, #tpu.memory_space<vmem>>, vector<8x1xf32>
    %29 = vector.broadcast %28 : vector<8x1xf32> to vector<8x512xf32>
    %30 = arith.addf %27, %29 : vector<8x512xf32>
    %c0_13 = arith.constant 0 : index
    %c0_14 = arith.constant 0 : index
    %31 = vector.load %arg2[%c0_13, %c0_14] : memref<8x512xf32, #tpu.memory_space<vmem>>, vector<8x512xf32>
    %32 = tpu.concatenate %30, %31 in 0 : vector<8x512xf32>, vector<8x512xf32> -> vector<16x512xf32>
    %c0_15 = arith.constant 0 : index
    %c0_16 = arith.constant 0 : index
    %33 = vector.load %arg8[%c0_15, %c0_16] : memref<8x144xf32, #tpu.memory_space<vmem>>, vector<8x144xf32>
    %c0_17 = arith.constant 0 : index
    %c0_18 = arith.constant 0 : index
    %34 = vector.load %arg9[%c0_17, %c0_18] : memref<8x1xf32, #tpu.memory_space<vmem>>, vector<8x1xf32>
    %c17_i32 = arith.constant 17 : i32
    %35 = tpu.dynamic_rotate %32 by %c17_i32 dim 1 : vector<16x512xf32>, i32 -> vector<16x512xf32>
    %36 = vector.extract_strided_slice %1 {offsets = [0, 0], sizes = [1, 512], strides = [1, 1]} : vector<9x512xf32> to vector<1x512xf32>
    %37 = vector.broadcast %36 : vector<1x512xf32> to vector<16x512xf32>
    %38 = arith.mulf %35, %37 : vector<16x512xf32>
    %c0_19 = arith.constant 0 : index
    %c0_20 = arith.constant 0 : index
    %39 = vector.load %arg15[%c0_19, %c0_20] : memref<144x512xf32, #tpu.memory_space<vmem>>, vector<16x512xf32>
    tpu.vector_store %arg15[%c0_19, %c0_20], %38 {strides = array<i32>} : memref<144x512xf32, #tpu.memory_space<vmem>>, vector<16x512xf32>,
    %c16_i32 = arith.constant 16 : i32
    %40 = tpu.dynamic_rotate %32 by %c16_i32 dim 1 : vector<16x512xf32>, i32 -> vector<16x512xf32>
    %41 = vector.extract_strided_slice %1 {offsets = [1, 0], sizes = [1, 512], strides = [1, 1]} : vector<9x512xf32> to vector<1x512xf32>
    %42 = vector.broadcast %41 : vector<1x512xf32> to vector<16x512xf32>
    %43 = arith.mulf %40, %42 : vector<16x512xf32>
    %c16 = arith.constant 16 : index
    %c0_21 = arith.constant 0 : index
    %44 = vector.load %arg15[%c16, %c0_21] : memref<144x512xf32, #tpu.memory_space<vmem>>, vector<16x512xf32>
    tpu.vector_store %arg15[%c16, %c0_21], %43 {strides = array<i32>} : memref<144x512xf32, #tpu.memory_space<vmem>>, vector<16x512xf32>,
    %c15_i32 = arith.constant 15 : i32
    %45 = tpu.dynamic_rotate %32 by %c15_i32 dim 1 : vector<16x512xf32>, i32 -> vector<16x512xf32>
    %46 = vector.extract_strided_slice %1 {offsets = [2, 0], sizes = [1, 512], strides = [1, 1]} : vector<9x512xf32> to vector<1x512xf32>
    %47 = vector.broadcast %46 : vector<1x512xf32> to vector<16x512xf32>
    %48 = arith.mulf %45, %47 : vector<16x512xf32>
    %c32 = arith.constant 32 : index
    %c0_22 = arith.constant 0 : index
    %49 = vector.load %arg15[%c32, %c0_22] : memref<144x512xf32, #tpu.memory_space<vmem>>, vector<16x512xf32>
    tpu.vector_store %arg15[%c32, %c0_22], %48 {strides = array<i32>} : memref<144x512xf32, #tpu.memory_space<vmem>>, vector<16x512xf32>,
    %c1_i32 = arith.constant 1 : i32
    %50 = tpu.dynamic_rotate %32 by %c1_i32 dim 1 : vector<16x512xf32>, i32 -> vector<16x512xf32>
    %51 = vector.extract_strided_slice %1 {offsets = [3, 0], sizes = [1, 512], strides = [1, 1]} : vector<9x512xf32> to vector<1x512xf32>
    %52 = vector.broadcast %51 : vector<1x512xf32> to vector<16x512xf32>
    %53 = arith.mulf %50, %52 : vector<16x512xf32>
    %c48 = arith.constant 48 : index
    %c0_23 = arith.constant 0 : index
    %54 = vector.load %arg15[%c48, %c0_23] : memref<144x512xf32, #tpu.memory_space<vmem>>, vector<16x512xf32>
    tpu.vector_store %arg15[%c48, %c0_23], %53 {strides = array<i32>} : memref<144x512xf32, #tpu.memory_space<vmem>>, vector<16x512xf32>,
    %55 = vector.extract_strided_slice %1 {offsets = [4, 0], sizes = [1, 512], strides = [1, 1]} : vector<9x512xf32> to vector<1x512xf32>
    %56 = vector.broadcast %55 : vector<1x512xf32> to vector<16x512xf32>
    %57 = arith.mulf %32, %56 : vector<16x512xf32>
    %c64 = arith.constant 64 : index
    %c0_24 = arith.constant 0 : index
    %58 = vector.load %arg15[%c64, %c0_24] : memref<144x512xf32, #tpu.memory_space<vmem>>, vector<16x512xf32>
    tpu.vector_store %arg15[%c64, %c0_24], %57 {strides = array<i32>} : memref<144x512xf32, #tpu.memory_space<vmem>>, vector<16x512xf32>,
    %c511_i32 = arith.constant 511 : i32
    %59 = tpu.dynamic_rotate %32 by %c511_i32 dim 1 : vector<16x512xf32>, i32 -> vector<16x512xf32>
    %60 = vector.extract_strided_slice %1 {offsets = [5, 0], sizes = [1, 512], strides = [1, 1]} : vector<9x512xf32> to vector<1x512xf32>
    %61 = vector.broadcast %60 : vector<1x512xf32> to vector<16x512xf32>
    %62 = arith.mulf %59, %61 : vector<16x512xf32>
    %c80 = arith.constant 80 : index
    %c0_25 = arith.constant 0 : index
    %63 = vector.load %arg15[%c80, %c0_25] : memref<144x512xf32, #tpu.memory_space<vmem>>, vector<16x512xf32>
    tpu.vector_store %arg15[%c80, %c0_25], %62 {strides = array<i32>} : memref<144x512xf32, #tpu.memory_space<vmem>>, vector<16x512xf32>,
    %c497_i32 = arith.constant 497 : i32
    %64 = tpu.dynamic_rotate %32 by %c497_i32 dim 1 : vector<16x512xf32>, i32 -> vector<16x512xf32>
    %65 = vector.extract_strided_slice %1 {offsets = [6, 0], sizes = [1, 512], strides = [1, 1]} : vector<9x512xf32> to vector<1x512xf32>
    %66 = vector.broadcast %65 : vector<1x512xf32> to vector<16x512xf32>
    %67 = arith.mulf %64, %66 : vector<16x512xf32>
    %c96 = arith.constant 96 : index
    %c0_26 = arith.constant 0 : index
    %68 = vector.load %arg15[%c96, %c0_26] : memref<144x512xf32, #tpu.memory_space<vmem>>, vector<16x512xf32>
    tpu.vector_store %arg15[%c96, %c0_26], %67 {strides = array<i32>} : memref<144x512xf32, #tpu.memory_space<vmem>>, vector<16x512xf32>,
    %c496_i32 = arith.constant 496 : i32
    %69 = tpu.dynamic_rotate %32 by %c496_i32 dim 1 : vector<16x512xf32>, i32 -> vector<16x512xf32>
    %70 = vector.extract_strided_slice %1 {offsets = [7, 0], sizes = [1, 512], strides = [1, 1]} : vector<9x512xf32> to vector<1x512xf32>
    %71 = vector.broadcast %70 : vector<1x512xf32> to vector<16x512xf32>
    %72 = arith.mulf %69, %71 : vector<16x512xf32>
    %c112 = arith.constant 112 : index
    %c0_27 = arith.constant 0 : index
    %73 = vector.load %arg15[%c112, %c0_27] : memref<144x512xf32, #tpu.memory_space<vmem>>, vector<16x512xf32>
    tpu.vector_store %arg15[%c112, %c0_27], %72 {strides = array<i32>} : memref<144x512xf32, #tpu.memory_space<vmem>>, vector<16x512xf32>,
    %c495_i32 = arith.constant 495 : i32
    %74 = tpu.dynamic_rotate %32 by %c495_i32 dim 1 : vector<16x512xf32>, i32 -> vector<16x512xf32>
    %75 = vector.extract_strided_slice %1 {offsets = [8, 0], sizes = [1, 512], strides = [1, 1]} : vector<9x512xf32> to vector<1x512xf32>
    %76 = vector.broadcast %75 : vector<1x512xf32> to vector<16x512xf32>
    %77 = arith.mulf %74, %76 : vector<16x512xf32>
    %c128 = arith.constant 128 : index
    %c0_28 = arith.constant 0 : index
    %78 = vector.load %arg15[%c128, %c0_28] : memref<144x512xf32, #tpu.memory_space<vmem>>, vector<16x512xf32>
    tpu.vector_store %arg15[%c128, %c0_28], %77 {strides = array<i32>} : memref<144x512xf32, #tpu.memory_space<vmem>>, vector<16x512xf32>,
    %c0_29 = arith.constant 0 : index
    %c0_30 = arith.constant 0 : index
    %79 = vector.load %arg15[%c0_29, %c0_30] : memref<144x512xf32, #tpu.memory_space<vmem>>, vector<144x512xf32>
    %cst_31 = arith.constant dense<0.000000e+00> : vector<8x512xf32>
    %80 = tpu.matmul %33, %79, %cst_31 {dimension_numbers = #tpu.dot_dimension_numbers<[1], [0], [0], [1], [0, 0, 1, 1], [], []>} : vector<8x144xf32>, vector<144x512xf32>, vector<8x512xf32> -> vector<8x512xf32>
    %81 = vector.broadcast %34 : vector<8x1xf32> to vector<8x512xf32>
    %82 = arith.addf %80, %81 : vector<8x512xf32>
    %cst_32 = arith.constant 0.000000e+00 : f32
    %83 = vector.broadcast %cst_32 : f32 to vector<8x512xf32>
    %84 = arith.maximumf %82, %83 : vector<8x512xf32>
    %c0_33 = arith.constant 0 : index
    %c0_34 = arith.constant 0 : index
    %85 = vector.load %arg10[%c0_33, %c0_34] : memref<8x72xf32, #tpu.memory_space<vmem>>, vector<8x72xf32>
    %c0_35 = arith.constant 0 : index
    %c0_36 = arith.constant 0 : index
    %86 = vector.load %arg11[%c0_35, %c0_36] : memref<8x1xf32, #tpu.memory_space<vmem>>, vector<8x1xf32>
    %c17_i32_37 = arith.constant 17 : i32
    %87 = tpu.dynamic_rotate %84 by %c17_i32_37 dim 1 : vector<8x512xf32>, i32 -> vector<8x512xf32>
    %88 = vector.extract_strided_slice %1 {offsets = [0, 0], sizes = [1, 512], strides = [1, 1]} : vector<9x512xf32> to vector<1x512xf32>
    %89 = vector.broadcast %88 : vector<1x512xf32> to vector<8x512xf32>
    %90 = arith.mulf %87, %89 : vector<8x512xf32>
    %c0_38 = arith.constant 0 : index
    %c0_39 = arith.constant 0 : index
    %91 = vector.load %arg16[%c0_38, %c0_39] : memref<72x512xf32, #tpu.memory_space<vmem>>, vector<8x512xf32>
    tpu.vector_store %arg16[%c0_38, %c0_39], %90 {strides = array<i32>} : memref<72x512xf32, #tpu.memory_space<vmem>>, vector<8x512xf32>,
    %c16_i32_40 = arith.constant 16 : i32
    %92 = tpu.dynamic_rotate %84 by %c16_i32_40 dim 1 : vector<8x512xf32>, i32 -> vector<8x512xf32>
    %93 = vector.extract_strided_slice %1 {offsets = [1, 0], sizes = [1, 512], strides = [1, 1]} : vector<9x512xf32> to vector<1x512xf32>
    %94 = vector.broadcast %93 : vector<1x512xf32> to vector<8x512xf32>
    %95 = arith.mulf %92, %94 : vector<8x512xf32>
    %c8 = arith.constant 8 : index
    %c0_41 = arith.constant 0 : index
    %96 = vector.load %arg16[%c8, %c0_41] : memref<72x512xf32, #tpu.memory_space<vmem>>, vector<8x512xf32>
    tpu.vector_store %arg16[%c8, %c0_41], %95 {strides = array<i32>} : memref<72x512xf32, #tpu.memory_space<vmem>>, vector<8x512xf32>,
    %c15_i32_42 = arith.constant 15 : i32
    %97 = tpu.dynamic_rotate %84 by %c15_i32_42 dim 1 : vector<8x512xf32>, i32 -> vector<8x512xf32>
    %98 = vector.extract_strided_slice %1 {offsets = [2, 0], sizes = [1, 512], strides = [1, 1]} : vector<9x512xf32> to vector<1x512xf32>
    %99 = vector.broadcast %98 : vector<1x512xf32> to vector<8x512xf32>
    %100 = arith.mulf %97, %99 : vector<8x512xf32>
    %c16_43 = arith.constant 16 : index
    %c0_44 = arith.constant 0 : index
    %101 = vector.load %arg16[%c16_43, %c0_44] : memref<72x512xf32, #tpu.memory_space<vmem>>, vector<8x512xf32>
    tpu.vector_store %arg16[%c16_43, %c0_44], %100 {strides = array<i32>} : memref<72x512xf32, #tpu.memory_space<vmem>>, vector<8x512xf32>,
    %c1_i32_45 = arith.constant 1 : i32
    %102 = tpu.dynamic_rotate %84 by %c1_i32_45 dim 1 : vector<8x512xf32>, i32 -> vector<8x512xf32>
    %103 = vector.extract_strided_slice %1 {offsets = [3, 0], sizes = [1, 512], strides = [1, 1]} : vector<9x512xf32> to vector<1x512xf32>
    %104 = vector.broadcast %103 : vector<1x512xf32> to vector<8x512xf32>
    %105 = arith.mulf %102, %104 : vector<8x512xf32>
    %c24 = arith.constant 24 : index
    %c0_46 = arith.constant 0 : index
    %106 = vector.load %arg16[%c24, %c0_46] : memref<72x512xf32, #tpu.memory_space<vmem>>, vector<8x512xf32>
    tpu.vector_store %arg16[%c24, %c0_46], %105 {strides = array<i32>} : memref<72x512xf32, #tpu.memory_space<vmem>>, vector<8x512xf32>,
    %107 = vector.extract_strided_slice %1 {offsets = [4, 0], sizes = [1, 512], strides = [1, 1]} : vector<9x512xf32> to vector<1x512xf32>
    %108 = vector.broadcast %107 : vector<1x512xf32> to vector<8x512xf32>
    %109 = arith.mulf %84, %108 : vector<8x512xf32>
    %c32_47 = arith.constant 32 : index
    %c0_48 = arith.constant 0 : index
    %110 = vector.load %arg16[%c32_47, %c0_48] : memref<72x512xf32, #tpu.memory_space<vmem>>, vector<8x512xf32>
    tpu.vector_store %arg16[%c32_47, %c0_48], %109 {strides = array<i32>} : memref<72x512xf32, #tpu.memory_space<vmem>>, vector<8x512xf32>,
    %c511_i32_49 = arith.constant 511 : i32
    %111 = tpu.dynamic_rotate %84 by %c511_i32_49 dim 1 : vector<8x512xf32>, i32 -> vector<8x512xf32>
    %112 = vector.extract_strided_slice %1 {offsets = [5, 0], sizes = [1, 512], strides = [1, 1]} : vector<9x512xf32> to vector<1x512xf32>
    %113 = vector.broadcast %112 : vector<1x512xf32> to vector<8x512xf32>
    %114 = arith.mulf %111, %113 : vector<8x512xf32>
    %c40 = arith.constant 40 : index
    %c0_50 = arith.constant 0 : index
    %115 = vector.load %arg16[%c40, %c0_50] : memref<72x512xf32, #tpu.memory_space<vmem>>, vector<8x512xf32>
    tpu.vector_store %arg16[%c40, %c0_50], %114 {strides = array<i32>} : memref<72x512xf32, #tpu.memory_space<vmem>>, vector<8x512xf32>,
    %c497_i32_51 = arith.constant 497 : i32
    %116 = tpu.dynamic_rotate %84 by %c497_i32_51 dim 1 : vector<8x512xf32>, i32 -> vector<8x512xf32>
    %117 = vector.extract_strided_slice %1 {offsets = [6, 0], sizes = [1, 512], strides = [1, 1]} : vector<9x512xf32> to vector<1x512xf32>
    %118 = vector.broadcast %117 : vector<1x512xf32> to vector<8x512xf32>
    %119 = arith.mulf %116, %118 : vector<8x512xf32>
    %c48_52 = arith.constant 48 : index
    %c0_53 = arith.constant 0 : index
    %120 = vector.load %arg16[%c48_52, %c0_53] : memref<72x512xf32, #tpu.memory_space<vmem>>, vector<8x512xf32>
    tpu.vector_store %arg16[%c48_52, %c0_53], %119 {strides = array<i32>} : memref<72x512xf32, #tpu.memory_space<vmem>>, vector<8x512xf32>,
    %c496_i32_54 = arith.constant 496 : i32
    %121 = tpu.dynamic_rotate %84 by %c496_i32_54 dim 1 : vector<8x512xf32>, i32 -> vector<8x512xf32>
    %122 = vector.extract_strided_slice %1 {offsets = [7, 0], sizes = [1, 512], strides = [1, 1]} : vector<9x512xf32> to vector<1x512xf32>
    %123 = vector.broadcast %122 : vector<1x512xf32> to vector<8x512xf32>
    %124 = arith.mulf %121, %123 : vector<8x512xf32>
    %c56 = arith.constant 56 : index
    %c0_55 = arith.constant 0 : index
    %125 = vector.load %arg16[%c56, %c0_55] : memref<72x512xf32, #tpu.memory_space<vmem>>, vector<8x512xf32>
    tpu.vector_store %arg16[%c56, %c0_55], %124 {strides = array<i32>} : memref<72x512xf32, #tpu.memory_space<vmem>>, vector<8x512xf32>,
    %c495_i32_56 = arith.constant 495 : i32
    %126 = tpu.dynamic_rotate %84 by %c495_i32_56 dim 1 : vector<8x512xf32>, i32 -> vector<8x512xf32>
    %127 = vector.extract_strided_slice %1 {offsets = [8, 0], sizes = [1, 512], strides = [1, 1]} : vector<9x512xf32> to vector<1x512xf32>
    %128 = vector.broadcast %127 : vector<1x512xf32> to vector<8x512xf32>
    %129 = arith.mulf %126, %128 : vector<8x512xf32>
    %c64_57 = arith.constant 64 : index
    %c0_58 = arith.constant 0 : index
    %130 = vector.load %arg16[%c64_57, %c0_58] : memref<72x512xf32, #tpu.memory_space<vmem>>, vector<8x512xf32>
    tpu.vector_store %arg16[%c64_57, %c0_58], %129 {strides = array<i32>} : memref<72x512xf32, #tpu.memory_space<vmem>>, vector<8x512xf32>,
    %c0_59 = arith.constant 0 : index
    %c0_60 = arith.constant 0 : index
    %131 = vector.load %arg16[%c0_59, %c0_60] : memref<72x512xf32, #tpu.memory_space<vmem>>, vector<72x512xf32>
    %cst_61 = arith.constant dense<0.000000e+00> : vector<8x512xf32>
    %132 = tpu.matmul %85, %131, %cst_61 {dimension_numbers = #tpu.dot_dimension_numbers<[1], [0], [0], [1], [0, 0, 1, 1], [], []>} : vector<8x72xf32>, vector<72x512xf32>, vector<8x512xf32> -> vector<8x512xf32>
    %133 = vector.broadcast %86 : vector<8x1xf32> to vector<8x512xf32>
    %134 = arith.addf %132, %133 : vector<8x512xf32>
    %cst_62 = arith.constant 0.000000e+00 : f32
    %135 = vector.broadcast %cst_62 : f32 to vector<8x512xf32>
    %136 = arith.maximumf %134, %135 : vector<8x512xf32>
    %cst_63 = arith.constant dense<0.000000e+00> : vector<8xf32>
    %137 = vector.multi_reduction <add>, %136, %cst_63 [1] : vector<8x512xf32> to vector<8xf32>
    %138 = vector.shape_cast %137 : vector<8xf32> to vector<8x1xf32>
    %cst_64 = arith.constant 5.120000e+02 : f32
    %139 = vector.broadcast %cst_64 : f32 to vector<8x1xf32>
    %140 = arith.divf %138, %139 : vector<8x1xf32>
    %141 = vector.broadcast %140 : vector<8x1xf32> to vector<8x512xf32>
    %142 = arith.subf %136, %141 : vector<8x512xf32>
    %143 = arith.mulf %142, %142 : vector<8x512xf32>
    %cst_65 = arith.constant dense<0.000000e+00> : vector<8xf32>
    %144 = vector.multi_reduction <add>, %143, %cst_65 [1] : vector<8x512xf32> to vector<8xf32>
    %145 = vector.shape_cast %144 : vector<8xf32> to vector<8x1xf32>
    %cst_66 = arith.constant 5.120000e+02 : f32
    %146 = vector.broadcast %cst_66 : f32 to vector<8x1xf32>
    %147 = arith.divf %145, %146 : vector<8x1xf32>
    %cst_67 = arith.constant 9.99999974E-6 : f32
    %148 = vector.broadcast %cst_67 : f32 to vector<8x1xf32>
    %149 = arith.addf %147, %148 : vector<8x1xf32>
    %150 = math.rsqrt %149 : vector<8x1xf32>
    %c0_68 = arith.constant 0 : index
    %c0_69 = arith.constant 0 : index
    %151 = vector.load %arg12[%c0_68, %c0_69] : memref<8x1xf32, #tpu.memory_space<vmem>>, vector<8x1xf32>
    %152 = arith.mulf %150, %151 : vector<8x1xf32>
    %153 = vector.broadcast %152 : vector<8x1xf32> to vector<8x512xf32>
    %154 = arith.mulf %142, %153 : vector<8x512xf32>
    %c0_70 = arith.constant 0 : index
    %c0_71 = arith.constant 0 : index
    %155 = vector.load %arg13[%c0_70, %c0_71] : memref<8x1xf32, #tpu.memory_space<vmem>>, vector<8x1xf32>
    %156 = vector.broadcast %155 : vector<8x1xf32> to vector<8x512xf32>
    %157 = arith.addf %154, %156 : vector<8x512xf32>
    %c0_72 = arith.constant 0 : index
    %c0_73 = arith.constant 0 : index
    %158 = vector.load %arg14[%c0_72, %c0_73] : memref<8x512xf32, #tpu.memory_space<vmem>>, vector<8x512xf32>
    tpu.vector_store %arg14[%c0_72, %c0_73], %157 {strides = array<i32>} : memref<8x512xf32, #tpu.memory_space<vmem>>, vector<8x512xf32>,
    return
  }
  func.func @transform_0(%arg0: i32) -> (i32, i32) {
    %c0_i32 = arith.constant 0 : i32
    %c0_i32_0 = arith.constant 0 : i32
    %c0_i32_1 = arith.constant 0 : i32
    return %c0_i32, %c0_i32_0 : i32, i32
  }
  func.func @transform_1(%arg0: i32) -> (i32, i32) {
    %c0_i32 = arith.constant 0 : i32
    %c0_i32_0 = arith.constant 0 : i32
    %c0_i32_1 = arith.constant 0 : i32
    return %c0_i32, %c0_i32_0 : i32, i32
  }
  func.func @transform_2(%arg0: i32) -> (i32, i32) {
    %c0_i32 = arith.constant 0 : i32
    %c0_i32_0 = arith.constant 0 : i32
    %c0_i32_1 = arith.constant 0 : i32
    return %c0_i32, %c0_i32_0 : i32, i32
  }
  func.func @transform_3(%arg0: i32) -> (i32, i32) {
    %c0_i32 = arith.constant 0 : i32
    %c0_i32_0 = arith.constant 0 : i32
    %c0_i32_1 = arith.constant 0 : i32
    return %c0_i32, %c0_i32_0 : i32, i32
  }
  func.func @transform_4(%arg0: i32) -> (i32, i32) {
    %c0_i32 = arith.constant 0 : i32
    %c0_i32_0 = arith.constant 0 : i32
    %c0_i32_1 = arith.constant 0 : i32
    return %c0_i32, %c0_i32_0 : i32, i32
  }
  func.func @transform_5(%arg0: i32) -> (i32, i32) {
    %c0_i32 = arith.constant 0 : i32
    %c0_i32_0 = arith.constant 0 : i32
    %c0_i32_1 = arith.constant 0 : i32
    return %c0_i32, %c0_i32_0 : i32, i32
  }
  func.func @transform_6(%arg0: i32) -> (i32, i32) {
    %c0_i32 = arith.constant 0 : i32
    %c0_i32_0 = arith.constant 0 : i32
    %c0_i32_1 = arith.constant 0 : i32
    return %c0_i32, %c0_i32_0 : i32, i32
  }
  func.func @transform_7(%arg0: i32) -> (i32, i32) {
    %c0_i32 = arith.constant 0 : i32
    %c0_i32_0 = arith.constant 0 : i32
    %c0_i32_1 = arith.constant 0 : i32
    return %c0_i32, %c0_i32_0 : i32, i32
  }
  func.func @transform_8(%arg0: i32) -> (i32, i32) {
    %c0_i32 = arith.constant 0 : i32
    %c0_i32_0 = arith.constant 0 : i32
    %c0_i32_1 = arith.constant 0 : i32
    return %c0_i32, %c0_i32_0 : i32, i32
  }
  func.func @transform_9(%arg0: i32) -> (i32, i32) {
    %c0_i32 = arith.constant 0 : i32
    %c0_i32_0 = arith.constant 0 : i32
    %c0_i32_1 = arith.constant 0 : i32
    return %c0_i32, %c0_i32_0 : i32, i32
  }
  func.func @transform_10(%arg0: i32) -> (i32, i32) {
    %c0_i32 = arith.constant 0 : i32
    %c0_i32_0 = arith.constant 0 : i32
    %c0_i32_1 = arith.constant 0 : i32
    return %c0_i32, %c0_i32_0 : i32, i32
  }
  func.func @transform_11(%arg0: i32) -> (i32, i32) {
    %c0_i32 = arith.constant 0 : i32
    %c0_i32_0 = arith.constant 0 : i32
    %c0_i32_1 = arith.constant 0 : i32
    return %c0_i32, %c0_i32_0 : i32, i32
  }
  func.func @transform_12(%arg0: i32) -> (i32, i32) {
    %c0_i32 = arith.constant 0 : i32
    %c0_i32_0 = arith.constant 0 : i32
    %c0_i32_1 = arith.constant 0 : i32
    return %c0_i32, %c0_i32_0 : i32, i32
  }
  func.func @transform_13(%arg0: i32) -> (i32, i32) {
    %c0_i32 = arith.constant 0 : i32
    %c0_i32_0 = arith.constant 0 : i32
    %c0_i32_1 = arith.constant 0 : i32
    return %c0_i32, %c0_i32_0 : i32, i32
  }
}

</mosaic_0001>

<bundles_post_ra>
// kernel: decoder_forward.1
= control target key start
LH: loop header
LB: loop body
LE: loop exit
PB: predicated region body
PF: predicated region fallthrough
CT: control target
= control target key end

     0   :  { %v3176_v3 = vmov 0.0   ;;  %s1826_s29 = smov 113   ;;  %s1827_s30 = smov 127   ;;  %vm278_vm0 = vcmask 130048   ;;  %vm1591_vm9 = vcmask 588800   ;;  %s3162_s2 = inlined_call_operand.vmem [shape: f32[128,512], index: 2, kind: input, shape index: {}]   ;;  %s3163_s0 = inlined_call_operand.vmem [shape: f32[16,128], index: 0, kind: input, shape index: {}]   ;;  %s3164_s6 = inlined_call_operand.vmem [shape: f32[8,1], index: 6, kind: input, shape index: {}]   ;;  %s3165_s1 = inlined_call_operand.vmem [shape: f32[8,512], index: 1, kind: input, shape index: {}]   ;;  %s3166_s5 = inlined_call_operand.vmem [shape: f32[32,16], index: 5, kind: input, shape index: {}]   ;;  %s3167_s4 = inlined_call_operand.vmem [shape: f32[9,512], index: 4, kind: input, shape index: {}]   ;;  %s3168_s3 = inlined_call_operand.vmem [shape: f32[4,512], index: 3, kind: input, shape index: {}]   ;;  %s3169_s7 = inlined_call_operand.vmem [shape: f32[8,144], index: 7, kind: input, shape index: {}]   ;;  %s3170_s8 = inlined_call_operand.vmem [shape: f32[8,1], index: 8, kind: input, shape index: {}]   ;;  %s3171_s10 = inlined_call_operand.vmem [shape: f32[8,1], index: 10, kind: input, shape index: {}]   ;;  %s3172_s9 = inlined_call_operand.vmem [shape: f32[8,72], index: 9, kind: input, shape index: {}]   ;;  %s3173_s12 = inlined_call_operand.vmem [shape: f32[8,1], index: 12, kind: input, shape index: {}]   ;;  %s3174_s11 = inlined_call_operand.vmem [shape: f32[8,1], index: 11, kind: input, shape index: {}]   ;;  %s3175_s13 = inlined_call_operand.vmem [shape: f32[8,512], index: 13, kind: output, shape index: {}]  }
   0x1   :  { %v117_v0 = vld [vmem:[%s3162_s2 + $0x1e8] sm:$0xff]  ;;  %v119_v1 = vld [vmem:[%s3162_s2 + $0x1f8] sm:$0xff]  ;;  %v116_v2 = vld [vmem:[%s3162_s2 + $0x1e0] sm:$0xff]  ;;  %184 = vmatprep.mubr.f32.mxu0 %v3176_v3  ;;  %261 = vmatprep.mubr.f32.mxu1 %v3176_v3  ;;  %s1829_s14 = smov 15   ;;  %s1830_s22 = smov 16  }
   0x2   :  { %120 = vmatprep.subr.mxu0 %v117_v0  ;;  %197 = vmatprep.subr.mxu1 %v119_v1  ;;  %v118_v4 = vld [vmem:[%s3162_s2 + $0x1f0] sm:$0xff]  ;;  %v113_v5 = vld [vmem:[%s3162_s2 + $0x1c8] sm:$0xff]  ;;  %v115_v6 = vld [vmem:[%s3162_s2 + $0x1d8] sm:$0xff]  ;;  %s1831_s23 = smov 17  }
   0x3   :  { %121 = vmatpush1.msra.mxu0 %v116_v2  ;;  %198 = vmatpush1.msra.mxu1 %v118_v4  ;;  %v112_v7 = vld [vmem:[%s3162_s2 + $0x1c0] sm:$0xff]  ;;  %v114_v8 = vld [vmem:[%s3162_s2 + $0x1d0] sm:$0xff]  ;;  %v109_v9 = vld [vmem:[%s3162_s2 + $0x1a8] sm:$0xff]  ;;  %v1824_v4 = vmov 0  }
   0x4   :  { %122 = vmatprep.subr.mxu0 %v113_v5  ;;  %199 = vmatprep.subr.mxu1 %v115_v6  ;;  %v111_v10 = vld [vmem:[%s3162_s2 + $0x1b8] sm:$0xff]  ;;  %v108_v11 = vld [vmem:[%s3162_s2 + $0x1a0] sm:$0xff]  ;;  %v110_v12 = vld [vmem:[%s3162_s2 + $0x1b0] sm:$0xff] }
   0x5   :  { %123 = vmatpush1.msra.mxu0 %v112_v7  ;;  %200 = vmatpush1.msra.mxu1 %v114_v8  ;;  %v105_v13 = vld [vmem:[%s3162_s2 + $0x188] sm:$0xff]  ;;  %v107_v14 = vld [vmem:[%s3162_s2 + $0x198] sm:$0xff]  ;;  %v104_v15 = vld [vmem:[%s3162_s2 + $0x180] sm:$0xff] }
   0x6   :  { %124 = vmatprep.subr.mxu0 %v109_v9  ;;  %201 = vmatprep.subr.mxu1 %v111_v10  ;;  %v106_v16 = vld [vmem:[%s3162_s2 + $0x190] sm:$0xff]  ;;  %v101_v17 = vld [vmem:[%s3162_s2 + $0x168] sm:$0xff]  ;;  %v103_v18 = vld [vmem:[%s3162_s2 + $0x178] sm:$0xff] }
   0x7   :  { %125 = vmatpush1.msra.mxu0 %v108_v11  ;;  %202 = vmatpush1.msra.mxu1 %v110_v12  ;;  %v100_v19 = vld [vmem:[%s3162_s2 + $0x160] sm:$0xff]  ;;  %v102_v20 = vld [vmem:[%s3162_s2 + $0x170] sm:$0xff]  ;;  %v97_v21 = vld [vmem:[%s3162_s2 + $0x148] sm:$0xff] }
   0x8   :  { %126 = vmatprep.subr.mxu0 %v105_v13  ;;  %203 = vmatprep.subr.mxu1 %v107_v14  ;;  %v99_v22 = vld [vmem:[%s3162_s2 + $0x158] sm:$0xff]  ;;  %v96_v23 = vld [vmem:[%s3162_s2 + $0x140] sm:$0xff]  ;;  %v98_v24 = vld [vmem:[%s3162_s2 + $0x150] sm:$0xff] }
   0x9   :  { %127 = vmatpush1.msra.mxu0 %v104_v15  ;;  %204 = vmatpush1.msra.mxu1 %v106_v16  ;;  %v93_v25 = vld [vmem:[%s3162_s2 + $0x128] sm:$0xff]  ;;  %v95_v26 = vld [vmem:[%s3162_s2 + $0x138] sm:$0xff]  ;;  %v92_v27 = vld [vmem:[%s3162_s2 + $0x120] sm:$0xff] }
   0xa   :  { %128 = vmatprep.subr.mxu0 %v101_v17  ;;  %205 = vmatprep.subr.mxu1 %v103_v18  ;;  %v94_v28 = vld [vmem:[%s3162_s2 + $0x130] sm:$0xff]  ;;  %v89_v29 = vld [vmem:[%s3162_s2 + $0x108] sm:$0xff]  ;;  %v91_v30 = vld [vmem:[%s3162_s2 + $0x118] sm:$0xff] }
   0xb   :  { %129 = vmatpush1.msra.mxu0 %v100_v19  ;;  %206 = vmatpush1.msra.mxu1 %v102_v20  ;;  %v88_v31 = vld [vmem:[%s3162_s2 + $0x100] sm:$0xff]  ;;  %v90_v32 = vld [vmem:[%s3162_s2 + $0x110] sm:$0xff]  ;;  %v85_v33 = vld [vmem:[%s3162_s2 + $0xe8] sm:$0xff] }
   0xc   :  { %130 = vmatprep.subr.mxu0 %v97_v21  ;;  %207 = vmatprep.subr.mxu1 %v99_v22  ;;  %v87_v34 = vld [vmem:[%s3162_s2 + $0xf8] sm:$0xff]  ;;  %v84_v35 = vld [vmem:[%s3162_s2 + $0xe0] sm:$0xff]  ;;  %v86_v36 = vld [vmem:[%s3162_s2 + $0xf0] sm:$0xff]  ;;  %v471_v22 = vlaneseq }
   0xd   :  { %131 = vmatpush1.msra.mxu0 %v96_v23  ;;  %208 = vmatpush1.msra.mxu1 %v98_v24  ;;  %v81_v37 = vld [vmem:[%s3162_s2 + $0xc8] sm:$0xff]  ;;  %v83_v38 = vld [vmem:[%s3162_s2 + $0xd8] sm:$0xff]  ;;  %v80_v39 = vld [vmem:[%s3162_s2 + $0xc0] sm:$0xff] }
   0xe   :  { %132 = vmatprep.subr.mxu0 %v93_v25  ;;  %209 = vmatprep.subr.mxu1 %v95_v26  ;;  %v82_v40 = vld [vmem:[%s3162_s2 + $0xd0] sm:$0xff]  ;;  %v77_v41 = vld [vmem:[%s3162_s2 + $0xa8] sm:$0xff]  ;;  %v79_v42 = vld [vmem:[%s3162_s2 + $0xb8] sm:$0xff]  ;;  %v2212_v24 = vshrl.u32 %v471_v22, 7 }
   0xf   :  { %133 = vmatpush1.msra.mxu0 %v92_v27  ;;  %210 = vmatpush1.msra.mxu1 %v94_v28  ;;  %v76_v43 = vld [vmem:[%s3162_s2 + $0xa0] sm:$0xff]  ;;  %v78_v44 = vld [vmem:[%s3162_s2 + $0xb0] sm:$0xff]  ;;  %v73_v45 = vld [vmem:[%s3162_s2 + $0x88] sm:$0xff]  ;;  %v2217_v28 = vand.u32 127, %v471_v22 }
  0x10   :  { %134 = vmatprep.subr.mxu0 %v89_v29  ;;  %211 = vmatprep.subr.mxu1 %v91_v30  ;;  %v75_v46 = vld [vmem:[%s3162_s2 + $0x98] sm:$0xff]  ;;  %v72_v47 = vld [vmem:[%s3162_s2 + $0x80] sm:$0xff]  ;;  %v74_v48 = vld [vmem:[%s3162_s2 + $0x90] sm:$0xff]  ;;  %v2215_v27 = vsub.s32 7, %v2212_v24 }
  0x11   :  { %135 = vmatpush1.msra.mxu0 %v88_v31  ;;  %212 = vmatpush1.msra.mxu1 %v90_v32  ;;  %v69_v49 = vld [vmem:[%s3162_s2 + $0x68] sm:$0xff]  ;;  %v71_v50 = vld [vmem:[%s3162_s2 + $0x78] sm:$0xff]  ;;  %v68_v51 = vld [vmem:[%s3162_s2 + $0x60] sm:$0xff]  ;;  %vm1056_vm1 = vcmp.lt.s32.totalorder %v2217_v28, 112  ;;  %vm999_vm2 = vcmp.lt.s32.totalorder %v2217_v28, 113  ;;  %vm942_vm3 = vcmp.lt.s32.totalorder %v2217_v28, 127 }
  0x12   :  { %136 = vmatprep.subr.mxu0 %v85_v33  ;;  %213 = vmatprep.subr.mxu1 %v87_v34  ;;  %v70_v52 = vld [vmem:[%s3162_s2 + $0x70] sm:$0xff]  ;;  %v65_v53 = vld [vmem:[%s3162_s2 + $0x48] sm:$0xff]  ;;  %v67_v54 = vld [vmem:[%s3162_s2 + $0x58] sm:$0xff]  ;;  %vm853_vm4 = vcmp.lt.s32.totalorder %v2217_v28, 1  ;;  %vm796_vm5 = vcmp.lt.s32.totalorder %v2217_v28, 15  ;;  %vm739_vm6 = vcmp.lt.s32.totalorder %v2217_v28, 16 }
  0x13   :  { %137 = vmatpush1.msra.mxu0 %v84_v35  ;;  %214 = vmatpush1.msra.mxu1 %v86_v36  ;;  %v64_v55 = vld [vmem:[%s3162_s2 + $0x40] sm:$0xff]  ;;  %v66_v56 = vld [vmem:[%s3162_s2 + $0x50] sm:$0xff]  ;;  %v61_v57 = vld [vmem:[%s3162_s2 + $0x28] sm:$0xff]  ;;  %vm682_vm7 = vcmp.lt.s32.totalorder %v2217_v28, 17  ;;  %vm1113_vm8 = vcmp.lt.s32.totalorder %v2217_v28, 111 }
  0x14   :  { %138 = vmatprep.subr.mxu0 %v81_v37  ;;  %215 = vmatprep.subr.mxu1 %v83_v38  ;;  %v63_v58 = vld [vmem:[%s3162_s2 + $0x38] sm:$0xff]  ;;  %v60_v59 = vld [vmem:[%s3162_s2 + $0x20] sm:$0xff]  ;;  %v62_v60 = vld [vmem:[%s3162_s2 + $0x30] sm:$0xff] }
  0x15   :  { %139 = vmatpush1.msra.mxu0 %v80_v39  ;;  %216 = vmatpush1.msra.mxu1 %v82_v40  ;;  %v57_v61 = vld [vmem:[%s3162_s2 + $0x8] sm:$0xff]  ;;  %v59_v62 = vld [vmem:[%s3162_s2 + $0x18] sm:$0xff]  ;;  %v56_v63 = vld [vmem:[%s3162_s2] sm:$0xff] }
  0x16   :  { %140 = vmatprep.subr.mxu0 %v77_v41  ;;  %217 = vmatprep.subr.mxu1 %v79_v42  ;;  %v58_v0 = vld [vmem:[%s3162_s2 + $0x10] sm:$0xff]  ;;  %v54_v1 = vld [vmem:[%s3163_s0] sm:$0xff]  ;;  %v55_v2 = vld [vmem:[%s3163_s0 + $0x8] sm:$0xff]  ;;  %s1825_s0 = smov 112  }
  0x17   :  { %141 = vmatpush1.msra.mxu0 %v76_v43  ;;  %218 = vmatpush1.msra.mxu1 %v78_v44  ;;  %v647_v5 = vld [vmem:[%s3164_s6] sm:$0xff]  ;;  %v2113_v6 = vld [vmem:[%s3165_s1 + $0x10] sm:$0xff]  ;;  %v2120_v7 = vld [vmem:[%s3165_s1 + $0x8] sm:$0xff] }
  0x18   :  { %142 = vmatprep.subr.mxu0 %v73_v45  ;;  %219 = vmatprep.subr.mxu1 %v75_v46  ;;  %v2125_v8 = vld [vmem:[%s3165_s1] sm:$0xff]  ;;  %v2134_v9 = vld [vmem:[%s3165_s1 + $0x18] sm:$0xff]  ;;  %s1828_s1 = smov 1   ;;  %v275_v19 = vld [vmem:[%s3166_s5 + $0x8] sm:$0xff] }
  0x19   :  { %143 = vmatpush1.msra.mxu0 %v72_v47  ;;  %220 = vmatpush1.msra.mxu1 %v74_v48  ;;  %v274_v18 = vld [vmem:[%s3166_s5] sm:$0xff]  ;;  %v276_v20 = vld [vmem:[%s3166_s5 + $0x10] sm:$0xff]  ;;  %v277_v21 = vld [vmem:[%s3166_s5 + $0x18] sm:$0xff] }
  0x1a   :  { %144 = vmatprep.subr.mxu0 %v69_v49  ;;  %221 = vmatprep.subr.mxu1 %v71_v50  ;;  %v2222_v29 = vld [vmem:[%s3167_s4] sm:$0xff]  ;;  %v2227_v30 = vld [vmem:[%s3167_s4 + $0x18] sm:$0xff]  ;;  %v2237_v33 = vld [vmem:[%s3167_s4 + $0x10] sm:$0xff] }
  0x1b   :  { %145 = vmatpush1.msra.mxu0 %v68_v51  ;;  %222 = vmatpush1.msra.mxu1 %v70_v52  ;;  %v2232_v31 = vrot.slane %v2222_v29, %v2215_v27  ;;  %v2241_v35 = vrot.slane %v2227_v30, %v2215_v27  ;;  %v2249_v38 = vrot.slane %v2237_v33, %v2215_v27  ;;  %v2256_v40 = vld [vmem:[%s3167_s4 + $0x8] sm:$0xff] }
  0x1c   :  { %146 = vmatprep.subr.mxu0 %v65_v53  ;;  %223 = vmatprep.subr.mxu1 %v67_v54  ;;  %v2263_v43 = vrot.slane %v2256_v40, %v2215_v27 }
  0x1d   :  { %147 = vmatpush1.msra.mxu0 %v64_v55  ;;  %224 = vmatpush1.msra.mxu1 %v66_v56 }
  0x1e   :  { %148 = vmatprep.subr.mxu0 %v61_v57  ;;  %225 = vmatprep.subr.mxu1 %v63_v58 }
  0x1f   :  { %149 = vmatpush1.msra.mxu0 %v60_v59  ;;  %226 = vmatpush1.msra.mxu1 %v62_v60 }
  0x20   :  { %150 = vmatprep.subr.mxu0 %v57_v61  ;;  %227 = vmatprep.subr.mxu1 %v59_v62 }
  0x21   :  { %151 = vmatpush1.msra.mxu0 %v56_v63  ;;  %228 = vmatpush1.msra.mxu1 %v58_v0 }
  0x22   :  { %185 = vmatmul.mubr.f32.vlgmr.msra.gmra.mxu0 %v54_v1  ;;  %262 = vmatmul.mubr.f32.vlgmr.msra.gmra.mxu1 %v54_v1 }
  0x23   :  { %190 = vmatprep.mubr.f32.mxu0 %v3176_v3  ;;  %267 = vmatprep.mubr.f32.mxu1 %v3176_v3 }
  0x24   :  { %1819 = vset.pattern.permute.xlu0 %v1824_v4  ;;  %1820 = vset.pattern.permute.xlu1 %v1824_v4 }
  0x25   :  { %650 = vperm.xlu0 %1819, %v647_v5   ;;  %1050 = vrot.lane.b32.xlu1 %v2113_v6, %s1825_s0 }
  0x26   :  { %191 = vmatmul.mubr.f32.gmra.mxu0 %v55_v2  ;;  %268 = vmatmul.mubr.f32.gmra.mxu1 %v55_v2 }
  0x27   :  { %355 = vmatprep.mubr.f32.mxu0 %v3176_v3  ;;  %444 = vmatprep.mubr.f32.mxu1 %v3176_v3 }
  0x29   :  { %1046 = vrot.lane.b32.xlu0 %v2120_v7, %s1825_s0  ;;  %1042 = vrot.lane.b32.xlu1 %v2125_v8, %s1825_s0 }
  0x2d   :  { %1054 = vrot.lane.b32.xlu0 %v2134_v9, %s1825_s0  ;;  %993 = vrot.lane.b32.xlu1 %v2113_v6, %s1826_s29 }
  0x31   :  { %989 = vrot.lane.b32.xlu0 %v2120_v7, %s1826_s29  ;;  %985 = vrot.lane.b32.xlu1 %v2125_v8, %s1826_s29 }
  0x35   :  { %997 = vrot.lane.b32.xlu0 %v2134_v9, %s1826_s29  ;;  %936 = vrot.lane.b32.xlu1 %v2113_v6, %s1827_s30 }
  0x39   :  { %932 = vrot.lane.b32.xlu0 %v2120_v7, %s1827_s30  ;;  %928 = vrot.lane.b32.xlu1 %v2125_v8, %s1827_s30 }
  0x3d   :  { %940 = vrot.lane.b32.xlu0 %v2134_v9, %s1827_s30  ;;  %839 = vrot.lane.b32.xlu1 %v2125_v8, %s1828_s1 }
  0x41   :  { %843 = vrot.lane.b32.xlu0 %v2120_v7, %s1828_s1  ;;  %851 = vrot.lane.b32.xlu1 %v2134_v9, %s1828_s1 }
  0x45   :  { %847 = vrot.lane.b32.xlu0 %v2113_v6, %s1828_s1  ;;  %786 = vrot.lane.b32.xlu1 %v2120_v7, %s1829_s14 }
  0x49   :  { %782 = vrot.lane.b32.xlu0 %v2125_v8, %s1829_s14  ;;  %794 = vrot.lane.b32.xlu1 %v2134_v9, %s1829_s14 }
  0x4d   :  { %790 = vrot.lane.b32.xlu0 %v2113_v6, %s1829_s14  ;;  %729 = vrot.lane.b32.xlu1 %v2120_v7, %s1830_s22 }
  0x51   :  { %725 = vrot.lane.b32.xlu0 %v2125_v8, %s1830_s22  ;;  %737 = vrot.lane.b32.xlu1 %v2134_v9, %s1830_s22 }
  0x55   :  { %733 = vrot.lane.b32.xlu0 %v2113_v6, %s1830_s22  ;;  %670 = vrot.lane.b32.xlu1 %v2120_v7, %s1831_s23 }
  0x59   :  { %666 = vrot.lane.b32.xlu0 %v2125_v8, %s1831_s23  ;;  %678 = vrot.lane.b32.xlu1 %v2134_v9, %s1831_s23 }
  0x97   :  { %v1051_v25 = vpop.permute.xlu1 %1050 }
  0x9b   :  { %v1043_v32 = vpop.permute.xlu1 %1042 }
  0x9f   :  { %v994_v46 = vpop.permute.xlu1 %993 }
  0xa0   :  { %v2210_v23 = vpop.permute.xlu0 %650 }
  0xa3   :  { %v986_v49 = vpop.permute.xlu1 %985 }
  0xa4   :  { %v1047_v26 = vpop.permute.xlu0 %1046 }
  0xa5   :  { %v1060_v36 = vsel %vm1056_vm1, %v1047_v26, %v1051_v25  ;;  %v1062_v37 = vsel %vm1056_vm1, %v1043_v32, %v1047_v26 }
  0xa6   :  { %v1085_v44 = vmul.f32 %v2232_v31, %v1062_v37  ;;  %v1086_v47 = vmul.f32 %v2263_v43, %v1060_v36  ;;  %v2354_v37 = vsub.s32 1, %v2212_v24 }
  0xa7   :  { %v937_v55 = vpop.permute.xlu1 %936 }
  0xa8   :  { %v1055_v34 = vpop.permute.xlu0 %1054 }
  0xa9   :  { %v1064_v39 = vsel %vm1056_vm1, %v1055_v34, %v1043_v32  ;;  %v1058_v41 = vsel %vm1056_vm1, %v1051_v25, %v1055_v34 }
  0xaa   :  { %v1088_v42 = vmul.f32 %v2241_v35, %v1064_v39  ;;  %v1087_v45 = vmul.f32 %v2249_v38, %v1058_v41  ;;  %v2359_v39 = vld [vmem:[%s3168_s3 + $0x8] sm:$0xff]  ;;  %v2362_v41 = vsub.s32 0, %v2212_v24 }
  0xab   :  { %v929_v58 = vpop.permute.xlu1 %928 }
  0xac   :  { %v990_v48 = vpop.permute.xlu0 %989 }
  0xad   :  { %v2271_v50 = vsel %vm999_vm2, %v990_v48, %v994_v46  ;;  %v2275_v51 = vsel %vm999_vm2, %v986_v49, %v990_v48 }
  0xaf   :  { %v840_v63 = vpop.permute.xlu1 %839 }
  0xb0   :  { %v998_v52 = vpop.permute.xlu0 %997 }
  0xb1   :  { %v2279_v53 = vsel %vm999_vm2, %v994_v46, %v998_v52  ;;  %v2283_v54 = vsel %vm999_vm2, %v998_v52, %v986_v49  ;;  %v2379_v52 = vsub.s32 3, %v2212_v24 }
  0xb3   :  { %v852_v2 = vpop.permute.xlu1 %851 }
  0xb4   :  { %v933_v56 = vpop.permute.xlu0 %932  ;;  %v2309_v4 = vsel %vm853_vm4, %v852_v2, %v840_v63 }
  0xb5   :  { %v2288_v57 = vsel %vm942_vm3, %v933_v56, %v937_v55  ;;  %v2292_v59 = vsel %vm942_vm3, %v929_v58, %v933_v56  ;;  %3188 = vst [vmem:[#allocation5_spill] sm:$0xff] %v2309_v4 }
  0xb8   :  { %v941_v60 = vpop.permute.xlu0 %940 }
  0xb9   :  { %v2296_v61 = vsel %vm942_vm3, %v937_v55, %v941_v60  ;;  %v2300_v62 = vsel %vm942_vm3, %v941_v60, %v929_v58 }
  0xbc   :  { %v844_v0 = vpop.permute.xlu0 %843 }
  0xbd   :  { %v2305_v1 = vsel %vm853_vm4, %v840_v63, %v844_v0 }
  0xbe   :  { %3187 = vst [vmem:[#allocation4_spill] sm:$0xff] %v2305_v1 }
  0xc0   :  { %v848_v5 = vpop.permute.xlu0 %847 }
  0xe2   :  { %v186_v10 = vpop.f32.mrf.mxu0  ;;  %v263_v11 = vpop.f32.mrf.mxu1 }
  0xe4   :  { %v188_v12 = vpop.f32.mrf.mxu0  ;;  %v265_v13 = vpop.f32.mrf.mxu1 }
  0xe6   :  { %v192_v14 = vpop.f32.mrf.mxu0  ;;  %v269_v15 = vpop.f32.mrf.mxu1 }
  0xe8   :  { %v194_v16 = vpop.f32.mrf.mxu0  ;;  %v271_v17 = vpop.f32.mrf.mxu1 }
  0xe9   :  { %319 = vmatprep.subr.mxu0 %v194_v16  ;;  %408 = vmatprep.subr.mxu1 %v271_v17 }
  0xea   :  { %320 = vmatpush1.msra.mxu0 %v192_v14  ;;  %409 = vmatpush1.msra.mxu1 %v269_v15 }
  0xeb   :  { %321 = vmatprep.subr.mxu0 %v188_v12  ;;  %410 = vmatprep.subr.mxu1 %v265_v13  ;;  %v787_v12 = vpop.permute.xlu1 %786  ;;  %v783_v13 = vpop.permute.xlu0 %782 }
  0xec   :  { %322 = vmatpush1.msra.mxu0 %v186_v10  ;;  %411 = vmatpush1.msra.mxu1 %v263_v11  ;;  %v2313_v10 = vsel %vm853_vm4, %v848_v5, %v852_v2  ;;  %v2317_v11 = vsel %vm853_vm4, %v844_v0, %v848_v5  ;;  %v2322_v14 = vsel %vm796_vm5, %v783_v13, %v787_v12 }
  0xed   :  { %1793 = vmatmul.mubr.msk.f32.vlgmr.msra.gmra.mxu0 %vm278_vm0, %v274_v18  ;;  %1797 = vmatmul.mubr.msk.f32.vlgmr.msra.gmra.mxu1 %vm278_vm0, %v274_v18  ;;  %3189 = vst [vmem:[#allocation6_spill] sm:$0xff] %v2313_v10  ;;  %3190 = vst [vmem:[#allocation7_spill] sm:$0xff] %v2317_v11 }
  0xee   :  { %361 = vmatprep.mubr.f32.mxu0 %v3176_v3  ;;  %450 = vmatprep.mubr.f32.mxu1 %v3176_v3  ;;  %3191 = vst [vmem:[#allocation8_spill] sm:$0xff] %v2322_v14 }
  0xef   :  { %1305 = vmatprep.subr.mxu1 %v1088_v42  ;;  %1234 = vmatprep.subr.mxu0 %v1086_v47  ;;  %v795_v15 = vpop.permute.xlu1 %794  ;;  %v791_v17 = vpop.permute.xlu0 %790  ;;  %v2365_v42 = vsub.s32 2, %v2212_v24  ;;  %v526_v47 = vrot.slane %v2359_v39, %v2354_v37 }
  0xf0   :  { %1306 = vmatpush1.msra.mxu1 %v1087_v45  ;;  %1235 = vmatpush1.msra.mxu0 %v1085_v44  ;;  %v2326_v16 = vsel %vm796_vm5, %v795_v15, %v783_v13  ;;  %v2330_v18 = vsel %vm796_vm5, %v791_v17, %v795_v15  ;;  %v2370_v44 = vld [vmem:[%s3168_s3] sm:$0xff]  ;;  %v482_v45 = vrot.slane %v2359_v39, %v2362_v41  ;;  %s1832_s3 = smov 111  }
  0xf1   :  { %1794 = vmatmul.mubr.msk.f32.gmra.mxu0 %vm278_vm0, %v275_v19  ;;  %1798 = vmatmul.mubr.msk.f32.gmra.mxu1 %vm278_vm0, %v275_v19  ;;  %3192 = vst [vmem:[#allocation9_spill] sm:$0xff] %v2326_v16  ;;  %3193 = vst [vmem:[#allocation10_spill] sm:$0xff] %v2330_v18  ;;  %v2334_v19 = vsel %vm796_vm5, %v787_v12, %v791_v17  ;;  %v518_v46 = vrot.slane %v2370_v44, %v2354_v37 }
  0xf2   :  { %367 = vmatprep.mubr.f32.mxu0 %v3176_v3  ;;  %456 = vmatprep.mubr.f32.mxu1 %v3176_v3  ;;  %3194 = vst [vmem:[#allocation11_spill] sm:$0xff] %v2334_v19  ;;  %v474_v55 = vrot.slane %v2370_v44, %v2362_v41  ;;  %v562_v56 = vrot.slane %v2370_v44, %v2365_v42 }
  0xf3   :  { %v570_v58 = vrot.slane %v2359_v39, %v2365_v42  ;;  %v502_v0 = vrot.slane %v482_v45, %v2362_v41  ;;  %v538_v2 = vrot.slane %v518_v46, %v2354_v37  ;;  %v546_v5 = vrot.slane %v526_v47, %v2354_v37 }
  0xf4   :  { %v606_v15 = vrot.slane %v2370_v44, %v2379_v52  ;;  %v494_v17 = vrot.slane %v474_v55, %v2362_v41 }
  0xf5   :  { %1795 = vmatmul.mubr.msk.f32.gmra.mxu0 %vm278_vm0, %v276_v20  ;;  %1799 = vmatmul.mubr.msk.f32.gmra.mxu1 %vm278_vm0, %v276_v20  ;;  %v730_v20 = vpop.permute.xlu1 %729 }
  0xf6   :  { %373 = vmatprep.mubr.f32.mxu0 %v3176_v3  ;;  %462 = vmatprep.mubr.f32.mxu1 %v3176_v3 }
  0xf9   :  { %1796 = vmatmul.mubr.msk.f32.gmra.mxu0 %vm278_vm0, %v277_v21  ;;  %1800 = vmatmul.mubr.msk.f32.gmra.mxu1 %vm278_vm0, %v277_v21  ;;  %v726_v21 = vpop.permute.xlu0 %725  ;;  %v738_v25 = vpop.permute.xlu1 %737 }
  0xfa   :  { %v2339_v22 = vsel %vm739_vm6, %v726_v21, %v730_v20  ;;  %v2343_v32 = vsel %vm739_vm6, %v738_v25, %v726_v21  ;;  %v590_v21 = vrot.slane %v570_v58, %v2365_v42 }
  0xfb   :  { %3195 = vst [vmem:[#allocation12_spill] sm:$0xff] %v2339_v22  ;;  %3196 = vst [vmem:[#allocation13_spill] sm:$0xff] %v2343_v32  ;;  %v626_v32 = vrot.slane %v606_v15, %v2379_v52 }
  0xfd   :  { %v734_v26 = vpop.permute.xlu0 %733 }
  0xfe   :  { %v2347_v34 = vsel %vm739_vm6, %v734_v26, %v738_v25  ;;  %v2351_v36 = vsel %vm739_vm6, %v730_v20, %v734_v26  ;;  %v582_v20 = vrot.slane %v562_v56, %v2365_v42  ;;  %v614_v25 = vrot.slane %v2359_v39, %v2379_v52 }
  0xff   :  { %3197 = vst [vmem:[#allocation14_spill] sm:$0xff] %v2347_v34  ;;  %3198 = vst [vmem:[#allocation15_spill] sm:$0xff] %v2351_v36 }
 0x100   :  { %v634_v55 = vrot.slane %v614_v25, %v2379_v52 }
 0x1ad   :  { %v357_v48 = vpop.f32.mrf.mxu0  ;;  %v446_v49 = vpop.f32.mrf.mxu1 }
 0x1ae   :  { %v509_v3 = vmul.f32 %v502_v0, %v446_v49  ;;  %v507_v22 = vmul.f32 %v494_v17, %v357_v48  ;;  %v618_v17 = vrot.slane %v2359_v39, %v2215_v27 }
 0x1af   :  { %v2387_v60 = vpop.f32.mrf.mxu0  ;;  %v2389_v63 = vpop.f32.mrf.mxu1 }
 0x1b1   :  { %v363_v12 = vpop.f32.mrf.mxu0  ;;  %v452_v13 = vpop.f32.mrf.mxu1 }
 0x1b2   :  { %v551_v46 = vmul.f32 %v538_v2, %v363_v12  ;;  %v553_v34 = vmul.f32 %v546_v5, %v452_v13 }
 0x1b3   :  { %v365_v26 = vpop.f32.mrf.mxu0  ;;  %v454_v45 = vpop.f32.mrf.mxu1 }
 0x1b4   :  { %v555_v58 = vadd.f32 %v551_v46, %v507_v22  ;;  %v557_v14 = vadd.f32 %v553_v34, %v509_v3  ;;  %v2414_v3 = vsub.s32 5, %v2212_v24 }
 0x1b5   :  { %v369_v47 = vpop.f32.mrf.mxu0  ;;  %v458_v36 = vpop.f32.mrf.mxu1 }
 0x1b6   :  { %v595_v18 = vmul.f32 %v582_v20, %v369_v47  ;;  %v597_v19 = vmul.f32 %v590_v21, %v458_v36 }
 0x1b7   :  { %v371_v56 = vpop.f32.mrf.mxu0  ;;  %v460_v16 = vpop.f32.mrf.mxu1 }
 0x1b8   :  { %v599_v4 = vadd.f32 %v595_v18, %v555_v58  ;;  %v601_v1 = vadd.f32 %v597_v19, %v557_v14  ;;  %v530_v18 = vrot.slane %v2359_v39, %v2414_v3  ;;  %v610_v19 = vrot.slane %v2370_v44, %v2215_v27 }
 0x1b9   :  { %v375_v10 = vpop.f32.mrf.mxu0  ;;  %v464_v11 = vpop.f32.mrf.mxu1 }
 0x1ba   :  { %v639_v49 = vmul.f32 %v626_v32, %v375_v10  ;;  %v641_v0 = vmul.f32 %v634_v55, %v464_v11  ;;  %v2417_v10 = vsub.s32 4, %v2212_v24  ;;  %v550_v15 = vrot.slane %v530_v18, %v2354_v37 }
 0x1bb   :  { %v377_v21 = vpop.f32.mrf.mxu0  ;;  %v466_v27 = vpop.f32.mrf.mxu1 }
 0x1bc   :  { %v643_v2 = vadd.f32 %v639_v49, %v599_v4  ;;  %v645_v5 = vadd.f32 %v641_v0, %v601_v1  ;;  %v2420_v1 = vsub.s32 6, %v2212_v24  ;;  %v522_v4 = vrot.slane %v2370_v44, %v2414_v3 }
 0x1bd   :  { %v478_v11 = vrot.slane %v2370_v44, %v2417_v10  ;;  %v486_v22 = vrot.slane %v2359_v39, %v2417_v10  ;;  %v554_v55 = vmul.f32 %v550_v15, %v454_v45  ;;  %v638_v49 = vrot.slane %v618_v17, %v2379_v52 }
 0x1be   :  { %v2404_v12 = vadd.f32 %v2210_v23, %v643_v2  ;;  %v2407_v48 = vadd.f32 %v2210_v23, %v645_v5  ;;  %v566_v14 = vrot.slane %v2370_v44, %v2420_v1  ;;  %v542_v24 = vrot.slane %v522_v4, %v2354_v37 }
 0x1bf   :  { %v498_v32 = vrot.slane %v478_v11, %v2362_v41  ;;  %v574_v36 = vrot.slane %v2359_v39, %v2420_v1  ;;  %v630_v44 = vrot.slane %v610_v19, %v2379_v52  ;;  %v506_v20 = vrot.slane %v486_v22, %v2362_v41  ;;  %v663_v11 = vld [vmem:[%s3170_s8] sm:$0xff] }
 0x1c0   :  { %1048 = vrot.lane.b32.xlu1 %v2407_v48, %s1825_s0  ;;  %837 = vrot.lane.b32.xlu0 %v2404_v12, %s1828_s1  ;;  %v586_v34 = vrot.slane %v566_v14, %v2365_v42  ;;  %v552_v13 = vmul.f32 %v542_v24, %v365_v26  ;;  %v642_v5 = vmul.f32 %v638_v49, %v466_v27  ;;  %v2532_v14 = vpop.permute.xlu1 %670  ;;  %v2534_v24 = vpop.permute.xlu0 %666 }
 0x1c1   :  { %v508_v25 = vmul.f32 %v498_v32, %v2387_v60  ;;  %v594_v47 = vrot.slane %v574_v36, %v2365_v42  ;;  %v640_v58 = vmul.f32 %v630_v44, %v377_v21  ;;  %v510_v39 = vmul.f32 %v506_v20, %v2389_v63 }
 0x1c2   :  { %v596_v46 = vmul.f32 %v586_v34, %v371_v56  ;;  %v2566_v49 = vrot.slane %v2222_v29, %v2420_v1 }
 0x1c3   :  { %v556_v26 = vadd.f32 %v552_v13, %v508_v25  ;;  %v598_v2 = vmul.f32 %v594_v47, %v460_v16  ;;  %v558_v60 = vadd.f32 %v554_v55, %v510_v39 }
 0x1c4   :  { %845 = vrot.lane.b32.xlu0 %v2407_v48, %s1828_s1  ;;  %1040 = vrot.lane.b32.xlu1 %v2404_v12, %s1825_s0  ;;  %v2536_v18 = vpop.permute.xlu1 %678  ;;  %3199 = vst [vmem:[#allocation16_spill] sm:$0xff] %v2566_v49 }
 0x1c5   :  { %v600_v0 = vadd.f32 %v596_v46, %v556_v26  ;;  %v602_v4 = vadd.f32 %v598_v2, %v558_v60  ;;  %v2560_v26 = vrot.slane %v2256_v40, %v2420_v1 }
 0x1c7   :  { %v644_v56 = vadd.f32 %v640_v58, %v600_v0  ;;  %v646_v63 = vadd.f32 %v642_v5, %v602_v4  ;;  %v1029_v60 = vmul.f32 %v2560_v26, %v2271_v50 }
 0x1c8   :  { %780 = vrot.lane.b32.xlu0 %v2404_v12, %s1829_s14  ;;  %991 = vrot.lane.b32.xlu1 %v2407_v48, %s1826_s29 }
 0x1c9   :  { %v2473_v16 = vadd.f32 %v2210_v23, %v644_v56  ;;  %v2480_v45 = vadd.f32 %v2210_v23, %v646_v63  ;;  %v662_v23 = vld [vmem:[%s3169_s7 + $0x8] sm:$0xff]  ;;  %v2578_v56 = vrot.slane %v2227_v30, %v2420_v1  ;;  %v1028_v63 = vmul.f32 %v2566_v49, %v2275_v51 }
 0x1ca   :  { %1805 = vmatprep.mubr.msk.f32.mxu0 %vm278_vm0, %v662_v23  ;;  %1806 = vmatprep.mubr.msk.f32.mxu1 %vm278_vm0, %v662_v23  ;;  %v2586_v23 = vrot.slane %v2237_v33, %v2420_v1  ;;  %v2598_v1 = vrot.slane %v2256_v40, %v2414_v3 }
 0x1cb   :  { %3200 = vst [vmem:[#allocation17_spill] sm:$0xff] %v2578_v56  ;;  %v1031_v51 = vmul.f32 %v2578_v56, %v2283_v54 }
 0x1cc   :  { %788 = vrot.lane.b32.xlu0 %v2407_v48, %s1829_s14  ;;  %983 = vrot.lane.b32.xlu1 %v2404_v12, %s1826_s29  ;;  %3201 = vst [vmem:[#allocation18_spill] sm:$0xff] %v2586_v23  ;;  %3202 = vst [vmem:[#allocation19_spill] sm:$0xff] %v2598_v1 }
 0x1d0   :  { %723 = vrot.lane.b32.xlu0 %v2404_v12, %s1830_s22  ;;  %934 = vrot.lane.b32.xlu1 %v2407_v48, %s1827_s30 }
 0x1d4   :  { %731 = vrot.lane.b32.xlu0 %v2407_v48, %s1830_s22  ;;  %926 = vrot.lane.b32.xlu1 %v2404_v12, %s1827_s30 }
 0x1d8   :  { %664 = vrot.lane.b32.xlu0 %v2404_v12, %s1831_s23  ;;  %1103 = vrot.lane.b32.xlu1 %v2120_v7, %s1832_s3 }
 0x1dc   :  { %1099 = vrot.lane.b32.xlu1 %v2125_v8, %s1832_s3  ;;  %1044 = vrot.lane.b32.xlu0 %v2473_v16, %s1825_s0 }
 0x1e0   :  { %1105 = vrot.lane.b32.xlu1 %v2407_v48, %s1832_s3  ;;  %1052 = vrot.lane.b32.xlu0 %v2480_v45, %s1825_s0 }
 0x1e4   :  { %841 = vrot.lane.b32.xlu1 %v2473_v16, %s1828_s1  ;;  %987 = vrot.lane.b32.xlu0 %v2473_v16, %s1826_s29 }
 0x1e8   :  { %849 = vrot.lane.b32.xlu1 %v2480_v45, %s1828_s1  ;;  %995 = vrot.lane.b32.xlu0 %v2480_v45, %s1826_s29 }
 0x1ec   :  { %784 = vrot.lane.b32.xlu1 %v2473_v16, %s1829_s14  ;;  %930 = vrot.lane.b32.xlu0 %v2473_v16, %s1827_s30 }
 0x1f0   :  { %792 = vrot.lane.b32.xlu1 %v2480_v45, %s1829_s14  ;;  %938 = vrot.lane.b32.xlu0 %v2480_v45, %s1827_s30 }
 0x1f4   :  { %727 = vrot.lane.b32.xlu1 %v2473_v16, %s1830_s22  ;;  %674 = vrot.lane.b32.xlu0 %v2113_v6, %s1831_s23 }
 0x1f8   :  { %735 = vrot.lane.b32.xlu1 %v2480_v45, %s1830_s22  ;;  %672 = vrot.lane.b32.xlu0 %v2407_v48, %s1831_s23 }
 0x1fc   :  { %668 = vrot.lane.b32.xlu1 %v2473_v16, %s1831_s23  ;;  %1107 = vrot.lane.b32.xlu0 %v2113_v6, %s1832_s3 }
 0x200   :  { %676 = vrot.lane.b32.xlu1 %v2480_v45, %s1831_s23  ;;  %1111 = vrot.lane.b32.xlu0 %v2134_v9, %s1832_s3 }
 0x204   :  { %1097 = vrot.lane.b32.xlu1 %v2404_v12, %s1832_s3  ;;  %1101 = vrot.lane.b32.xlu0 %v2473_v16, %s1832_s3 }
 0x208   :  { %1109 = vrot.lane.b32.xlu0 %v2480_v45, %s1832_s3  ;;  %1228 = vperm.xlu1 %1820, %v663_v11  }
 0x232   :  { %v1049_v19 = vpop.permute.xlu1 %1048  ;;  %v2538_v22 = vpop.permute.xlu0 %837 }
 0x236   :  { %v2540_v32 = vpop.permute.xlu0 %845  ;;  %v1041_v34 = vpop.permute.xlu1 %1040 }
 0x23a   :  { %v2542_v36 = vpop.permute.xlu0 %780  ;;  %v992_v13 = vpop.permute.xlu1 %991 }
 0x23e   :  { %v2544_v15 = vpop.permute.xlu0 %788  ;;  %v984_v44 = vpop.permute.xlu1 %983 }
 0x242   :  { %v2546_v17 = vpop.permute.xlu0 %723  ;;  %v2548_v20 = vpop.permute.xlu1 %934 }
 0x246   :  { %v2550_v21 = vpop.permute.xlu0 %731  ;;  %v2552_v25 = vpop.permute.xlu1 %926 }
 0x24a   :  { %v2554_v46 = vpop.permute.xlu0 %664  ;;  %v2556_v47 = vpop.permute.xlu1 %1103 }
 0x24e   :  { %v2562_v55 = vpop.permute.xlu1 %1099  ;;  %v1045_v58 = vpop.permute.xlu0 %1044 }
 0x24f   :  { %v1059_v27 = vsel %vm1056_vm1, %v1045_v58, %v1049_v19  ;;  %v1061_v39 = vsel %vm1056_vm1, %v1041_v34, %v1045_v58 }
 0x250   :  { %v1081_v0 = vmul.f32 %v2232_v31, %v1061_v39  ;;  %v1082_v2 = vmul.f32 %v2263_v43, %v1059_v27 }
 0x252   :  { %v2580_v5 = vpop.permute.xlu1 %1105  ;;  %1236 = vmatprep.subr.mxu0 %v1082_v2  ;;  %v1053_v4 = vpop.permute.xlu0 %1052 }
 0x253   :  { %v1057_v11 = vsel %vm1056_vm1, %v1049_v19, %v1053_v4  ;;  %v1063_v50 = vsel %vm1056_vm1, %v1053_v4, %v1041_v34  ;;  %1237 = vmatpush1.msra.mxu0 %v1081_v0  ;;  %v1030_v34 = vmul.f32 %v2586_v23, %v2279_v53  ;;  %v2606_v0 = vrot.slane %v2222_v29, %v2414_v3 }
 0x254   :  { %v1083_v58 = vmul.f32 %v2249_v38, %v1057_v11  ;;  %v1084_v27 = vmul.f32 %v2241_v35, %v1063_v50  ;;  %1238 = vmatprep.subr.mxu0 %v1029_v60  ;;  %v972_v53 = vmul.f32 %v2598_v1, %v2288_v57 }
 0x255   :  { %1239 = vmatpush1.msra.mxu0 %v1028_v63  ;;  %3203 = vst [vmem:[#allocation20_spill] sm:$0xff] %v2606_v0  ;;  %v2618_v63 = vrot.slane %v2227_v30, %v2414_v3 }
 0x256   :  { %v2600_v39 = vpop.permute.xlu1 %841  ;;  %1307 = vmatprep.subr.mxu1 %v1084_v27  ;;  %v988_v19 = vpop.permute.xlu0 %987  ;;  %v2626_v27 = vrot.slane %v2237_v33, %v2414_v3 }
 0x257   :  { %v1002_v2 = vsel %vm999_vm2, %v988_v19, %v992_v13  ;;  %v1004_v54 = vsel %vm999_vm2, %v984_v44, %v988_v19  ;;  %1308 = vmatpush1.msra.mxu1 %v1083_v58  ;;  %3204 = vst [vmem:[#allocation21_spill] sm:$0xff] %v2618_v63  ;;  %v971_v58 = vmul.f32 %v2606_v0, %v2292_v59 }
 0x258   :  { %v1024_v60 = vmul.f32 %v2566_v49, %v1004_v54  ;;  %v1025_v4 = vmul.f32 %v2560_v26, %v1002_v2  ;;  %1309 = vmatprep.subr.mxu1 %v1031_v51  ;;  %3205 = vst [vmem:[#allocation22_spill] sm:$0xff] %v2626_v27  ;;  %v2636_v59 = vrot.slane %v2222_v29, %v2417_v10 }
 0x259   :  { %1310 = vmatpush1.msra.mxu1 %v1030_v34  ;;  %v974_v3 = vmul.f32 %v2618_v63, %v2300_v62  ;;  %v2648_v54 = vrot.slane %v2227_v30, %v2417_v10  ;;  %v2658_v62 = vrot.slane %v2256_v40, %v2379_v52 }
 0x25a   :  { %v2620_v11 = vpop.permute.xlu1 %849  ;;  %1240 = vmatprep.subr.mxu0 %v1025_v4  ;;  %v996_v50 = vpop.permute.xlu0 %995  ;;  %3206 = vst [vmem:[#allocation23_spill] sm:$0xff] %v2636_v59  ;;  %v973_v4 = vmul.f32 %v2626_v27, %v2296_v61 }
 0x25b   :  { %v1000_v51 = vsel %vm999_vm2, %v992_v13, %v996_v50  ;;  %v1006_v57 = vsel %vm999_vm2, %v996_v50, %v984_v44  ;;  %1241 = vmatpush1.msra.mxu0 %v1024_v60  ;;  %v2644_v44 = vrot.slane %v2256_v40, %v2417_v10  ;;  %v2652_v60 = vrot.slane %v2237_v33, %v2417_v10 }
 0x25c   :  { %v1026_v19 = vmul.f32 %v2586_v23, %v1000_v51  ;;  %v1027_v34 = vmul.f32 %v2578_v56, %v1006_v57  ;;  %1242 = vmatprep.subr.mxu0 %v972_v53  ;;  %v2668_v10 = vrot.slane %v2222_v29, %v2379_v52  ;;  %v2676_v57 = vrot.slane %v2237_v33, %v2379_v52 }
 0x25d   :  { %1243 = vmatpush1.msra.mxu0 %v971_v58  ;;  %3207 = vst [vmem:[#allocation24_spill] sm:$0xff] %v2644_v44  ;;  %v915_v51 = vmul.f32 %v2644_v44, %v2120_v7  ;;  %v2694_v7 = vrot.slane %v2237_v33, %v2365_v42  ;;  %v911_v49 = vmul.f32 %v2644_v44, %v2473_v16  ;;  %v3212_v44 = vld [vmem:[#allocation8_spill] sm:$0xff] }
 0x25e   :  { %v2640_v2 = vpop.permute.xlu1 %784  ;;  %1311 = vmatprep.subr.mxu1 %v1027_v34  ;;  %v931_v13 = vpop.permute.xlu0 %930  ;;  %v2680_v34 = vrot.slane %v2227_v30, %v2379_v52  ;;  %v2698_v52 = vrot.slane %v2227_v30, %v2365_v42 }
 0x25f   :  { %v945_v53 = vsel %vm942_vm3, %v931_v13, %v2548_v20  ;;  %v947_v50 = vsel %vm942_vm3, %v2552_v25, %v931_v13  ;;  %1312 = vmatpush1.msra.mxu1 %v1026_v19  ;;  %v2684_v19 = vrot.slane %v2256_v40, %v2365_v42  ;;  %v914_v13 = vmul.f32 %v2636_v59, %v2125_v8 }
 0x260   :  { %v967_v58 = vmul.f32 %v2606_v0, %v947_v50  ;;  %v968_v61 = vmul.f32 %v2598_v1, %v945_v53  ;;  %1313 = vmatprep.subr.mxu1 %v974_v3  ;;  %v2690_v3 = vrot.slane %v2222_v29, %v2365_v42  ;;  %v2702_v53 = vrot.slane %v2256_v40, %v2354_v37 }
 0x261   :  { %1314 = vmatpush1.msra.mxu1 %v973_v4  ;;  %v2708_v50 = vrot.slane %v2222_v29, %v2354_v37  ;;  %v2712_v0 = vrot.slane %v2237_v33, %v2354_v37 }
 0x262   :  { %v2704_v4 = vpop.permute.xlu1 %792  ;;  %1244 = vmatprep.subr.mxu0 %v968_v61  ;;  %v939_v8 = vpop.permute.xlu0 %938  ;;  %v2722_v61 = vrot.slane %v2227_v30, %v2354_v37  ;;  %v910_v37 = vmul.f32 %v2636_v59, %v2404_v12  ;;  %v916_v12 = vmul.f32 %v2652_v60, %v2113_v6 }
 0x263   :  { %v943_v42 = vsel %vm942_vm3, %v2548_v20, %v939_v8  ;;  %v949_v1 = vsel %vm942_vm3, %v939_v8, %v2552_v25  ;;  %1245 = vmatpush1.msra.mxu0 %v967_v58  ;;  %v2730_v20 = vrot.slane %v2256_v40, %v2362_v41  ;;  %v2734_v25 = vrot.slane %v2222_v29, %v2362_v41  ;;  %v3210_v8 = vld [vmem:[#allocation7_spill] sm:$0xff] }
 0x264   :  { %v969_v56 = vmul.f32 %v2626_v27, %v943_v42  ;;  %v970_v23 = vmul.f32 %v2618_v63, %v949_v1  ;;  %1246 = vmatprep.subr.mxu0 %v915_v51  ;;  %v917_v58 = vmul.f32 %v2648_v54, %v2134_v9  ;;  %v3208_v1 = vld [vmem:[#allocation4_spill] sm:$0xff]  ;;  %v858_v40 = vsel %vm853_vm4, %v2538_v22, %v2600_v39  ;;  %v3213_v27 = vld [vmem:[#allocation9_spill] sm:$0xff]  ;;  %v3214_v63 = vld [vmem:[#allocation11_spill] sm:$0xff] }
 0x265   :  { %1247 = vmatpush1.msra.mxu0 %v914_v13  ;;  %v883_v51 = vmul.f32 %v2658_v62, %v3208_v1  ;;  %v3209_v13 = vld [vmem:[#allocation5_spill] sm:$0xff]  ;;  %v884_v42 = vmul.f32 %v2676_v57, %v3210_v8  ;;  %v3211_v1 = vld [vmem:[#allocation6_spill] sm:$0xff]  ;;  %v825_v6 = vmul.f32 %v2690_v3, %v3213_v27  ;;  %v912_v8 = vmul.f32 %v2652_v60, %v2407_v48 }
 0x266   :  { %v2746_v16 = vpop.permute.xlu1 %727  ;;  %1315 = vmatprep.subr.mxu1 %v970_v23  ;;  %v2748_v29 = vpop.permute.xlu0 %674  ;;  %1248 = vmatprep.subr.mxu0 %v911_v49  ;;  %v882_v9 = vmul.f32 %v2668_v10, %v3209_v13  ;;  %v885_v59 = vmul.f32 %v2680_v34, %v3211_v1  ;;  %v860_v23 = vsel %vm853_vm4, %v2620_v11, %v2538_v22 }
 0x267   :  { %1249 = vmatpush1.msra.mxu0 %v910_v37  ;;  %v826_v49 = vmul.f32 %v2684_v19, %v3212_v44  ;;  %v827_v13 = vmul.f32 %v2694_v7, %v3214_v63  ;;  %1316 = vmatpush1.msra.mxu1 %v969_v56  ;;  %v856_v22 = vsel %vm853_vm4, %v2600_v39, %v2540_v32 }
 0x268   :  { %v879_v37 = vmul.f32 %v2658_v62, %v858_v40  ;;  %1250 = vmatprep.subr.mxu0 %v883_v51  ;;  %1317 = vmatprep.subr.mxu1 %v917_v58  ;;  %v913_v27 = vmul.f32 %v2648_v54, %v2480_v45  ;;  %v854_v56 = vsel %vm853_vm4, %v2540_v32, %v2620_v11  ;;  %v3215_v58 = vld [vmem:[#allocation10_spill] sm:$0xff]  ;;  %v3216_v51 = vld [vmem:[#allocation12_spill] sm:$0xff]  ;;  %v3217_v11 = vld [vmem:[#allocation13_spill] sm:$0xff] }
 0x269   :  { %v878_v48 = vmul.f32 %v2668_v10, %v860_v23  ;;  %v801_v63 = vsel %vm796_vm5, %v2542_v36, %v2640_v2  ;;  %1251 = vmatpush1.msra.mxu0 %v882_v9  ;;  %1318 = vmatpush1.msra.mxu1 %v916_v12  ;;  %v828_v45 = vmul.f32 %v2698_v52, %v3215_v58  ;;  %v3218_v12 = vld [vmem:[#allocation15_spill] sm:$0xff] }
 0x26a   :  { %v736_v39 = vpop.permute.xlu1 %735  ;;  %v2787_v44 = vpop.permute.xlu0 %672  ;;  %v769_v40 = vmul.f32 %v2702_v53, %v3216_v51  ;;  %v803_v32 = vsel %vm796_vm5, %v2704_v4, %v2542_v36  ;;  %1319 = vmatprep.subr.mxu1 %v913_v27  ;;  %1252 = vmatprep.subr.mxu0 %v879_v37  ;;  %v768_v9 = vmul.f32 %v2708_v50, %v3217_v11 }
 0x26b   :  { %v2801_v1 = vmul.f32 %v2712_v0, %v3218_v12  ;;  %v688_v23 = vsel %vm682_vm7, %v2534_v24, %v2532_v14  ;;  %1253 = vmatpush1.msra.mxu0 %v878_v48  ;;  %1320 = vmatpush1.msra.mxu1 %v912_v8  ;;  %v880_v58 = vmul.f32 %v2676_v57, %v856_v22 }
 0x26c   :  { %v881_v36 = vmul.f32 %v2680_v34, %v854_v56  ;;  %v822_v37 = vmul.f32 %v2684_v19, %v801_v63  ;;  %1254 = vmatprep.subr.mxu0 %v826_v49  ;;  %1321 = vmatprep.subr.mxu1 %v885_v59  ;;  %v799_v27 = vsel %vm796_vm5, %v2640_v2, %v2544_v15  ;;  %v3219_v59 = vld [vmem:[#allocation14_spill] sm:$0xff] }
 0x26d   :  { %v797_v8 = vsel %vm796_vm5, %v2544_v15, %v2704_v4  ;;  %v821_v22 = vmul.f32 %v2690_v3, %v803_v32  ;;  %1255 = vmatpush1.msra.mxu0 %v825_v6  ;;  %1322 = vmatpush1.msra.mxu1 %v884_v42  ;;  %v771_v49 = vmul.f32 %v2722_v61, %v3219_v59  ;;  %v2843_v6 = vld [vmem:[%s3167_s4 + $0x20] ss:$0 sm:$0xff] }
 0x26e   :  { %v669_v56 = vpop.permute.xlu1 %668  ;;  %v2820_v48 = vpop.permute.xlu0 %1107  ;;  %v712_v63 = vmul.f32 %v2730_v20, %v688_v23  ;;  %v744_v2 = vsel %vm739_vm6, %v2546_v17, %v2746_v16  ;;  %1323 = vmatprep.subr.mxu1 %v881_v36  ;;  %1256 = vmatprep.subr.mxu0 %v822_v37  ;;  %v690_v15 = vsel %vm682_vm7, %v2536_v18, %v2534_v24 }
 0x26f   :  { %v2835_v4 = vrot.slane %v2227_v30, %v2362_v41  ;;  %v746_v42 = vsel %vm739_vm6, %v736_v39, %v2546_v17  ;;  %1257 = vmatpush1.msra.mxu0 %v821_v22  ;;  %1324 = vmatpush1.msra.mxu1 %v880_v58  ;;  %v1119_v24 = vsel %vm1113_vm8, %v2562_v55, %v2556_v47 }
 0x270   :  { %v823_v51 = vmul.f32 %v2694_v7, %v799_v27  ;;  %v824_v30 = vmul.f32 %v2698_v52, %v797_v8  ;;  %1258 = vmatprep.subr.mxu0 %v769_v40  ;;  %1325 = vmatprep.subr.mxu1 %v828_v45  ;;  %v742_v17 = vsel %vm739_vm6, %v2746_v16, %v2550_v21 }
 0x271   :  { %v765_v32 = vmul.f32 %v2702_v53, %v744_v2  ;;  %v684_v11 = vsel %vm682_vm7, %v2748_v29, %v2536_v18  ;;  %1259 = vmatpush1.msra.mxu0 %v768_v9  ;;  %1326 = vmatpush1.msra.mxu1 %v827_v13  ;;  %v740_v45 = vsel %vm739_vm6, %v2550_v21, %v736_v39 }
 0x272   :  { %v677_v12 = vpop.permute.xlu1 %676  ;;  %v1112_v23 = vpop.permute.xlu0 %1111  ;;  %v764_v40 = vmul.f32 %v2708_v50, %v746_v42  ;;  %v687_v16 = vsel %vm682_vm7, %v2554_v46, %v669_v56  ;;  %1327 = vmatprep.subr.mxu1 %v824_v30  ;;  %v711_v18 = vmul.f32 %v2734_v25, %v690_v15  ;;  %v1142_v13 = vmul.f32 %v2843_v6, %v1119_v24 }
 0x273   :  { %v689_v58 = vsel %vm682_vm7, %v677_v12, %v2554_v46  ;;  %v2874_v9 = vrot.slane %v2237_v33, %v2362_v41  ;;  %v686_v21 = vsel %vm682_vm7, %v2532_v14, %v2748_v29  ;;  %1260 = vmatprep.subr.mxu0 %v765_v32  ;;  %v766_v39 = vmul.f32 %v2712_v0, %v742_v17  ;;  %v2884_v46 = vld [vmem:[%s3167_s4 + $0x28] ss:$0 sm:$0xff]  ;;  %v661_v32 = vld [vmem:[%s3169_s7] sm:$0xff] }
 0x274   :  { %v1117_v36 = vsel %vm1113_vm8, %v2556_v47, %v2820_v48  ;;  %v707_v33 = vmul.f32 %v2734_v25, %v689_v58  ;;  %1261 = vmatpush1.msra.mxu0 %v764_v40  ;;  %1328 = vmatpush1.msra.mxu1 %v823_v51  ;;  %v714_v41 = vmul.f32 %v2835_v4, %v684_v11 }
 0x275   :  { %v767_v14 = vmul.f32 %v2722_v61, %v740_v45  ;;  %v708_v29 = vmul.f32 %v2730_v20, %v687_v16  ;;  %1262 = vmatprep.subr.mxu0 %v712_v63  ;;  %1329 = vmatprep.subr.mxu1 %v771_v49  ;;  %v683_v8 = vsel %vm682_vm7, %v2787_v44, %v677_v12 }
 0x276   :  { %v1098_v37 = vpop.permute.xlu1 %1097  ;;  %v1102_v27 = vpop.permute.xlu0 %1101  ;;  %1263 = vmatpush1.msra.mxu0 %v711_v18  ;;  %1330 = vmatpush1.msra.mxu1 %v2801_v1  ;;  %v685_v59 = vsel %vm682_vm7, %v669_v56, %v2787_v44  ;;  %v1143_v49 = vmul.f32 %v2884_v46, %v1117_v36  ;;  %v713_v2 = vmul.f32 %v2874_v9, %v686_v21  ;;  %v2912_v1 = vld [vmem:[%s3167_s4 + $0x38] ss:$0 sm:$0xff]  ;;  %v2922_v56 = vld [vmem:[%s3167_s4 + $0x30] ss:$0 sm:$0xff] }
 0x277   :  { %v1116_v47 = vsel %vm1113_vm8, %v1102_v27, %v2580_v5  ;;  %v1118_v22 = vsel %vm1113_vm8, %v1098_v37, %v1102_v27  ;;  %1331 = vmatprep.subr.mxu1 %v767_v14  ;;  %1264 = vmatprep.subr.mxu0 %v708_v29  ;;  %v1121_v15 = vsel %vm1113_vm8, %v1112_v23, %v2562_v55 }
 0x278   :  { %v1139_v63 = vmul.f32 %v2884_v46, %v1116_v47  ;;  %v1138_v42 = vmul.f32 %v2843_v6, %v1118_v22  ;;  %1265 = vmatpush1.msra.mxu0 %v707_v33  ;;  %1332 = vmatpush1.msra.mxu1 %v766_v39  ;;  %v710_v44 = vmul.f32 %v2835_v4, %v683_v8 }
 0x279   :  { %v1115_v24 = vsel %vm1113_vm8, %v2820_v48, %v1112_v23  ;;  %1294 = vmatprep.subr.mxu0 %v1143_v49  ;;  %1333 = vmatprep.subr.mxu1 %v714_v41  ;;  %v709_v55 = vmul.f32 %v2874_v9, %v685_v59  ;;  %v1145_v48 = vmul.f32 %v2912_v1, %v1121_v15 }
 0x27a   :  { %v1110_v51 = vpop.permute.xlu0 %1109  ;;  %1295 = vmatpush2.msra.mxu0 %v1142_v13  ;;  %1334 = vmatpush1.msra.mxu1 %v713_v2  ;;  %v1144_v12 = vmul.f32 %v2922_v56, %v1115_v24 }
 0x27b   :  { %v1114_v30 = vsel %vm1113_vm8, %v2580_v5, %v1110_v51  ;;  %v1120_v17 = vsel %vm1113_vm8, %v1110_v51, %v1098_v37  ;;  %1335 = vmatprep.subr.mxu1 %v710_v44  ;;  %1296 = vmatprep.subr.mxu0 %v1139_v63  ;;  %v3220_v5 = vmov 0.0   ;;  %v1381_v37 = vld [vmem:[%s3171_s10] sm:$0xff] }
 0x27c   :  { %v1141_v11 = vmul.f32 %v2912_v1, %v1120_v17  ;;  %v1140_v23 = vmul.f32 %v2922_v56, %v1114_v30  ;;  %1297 = vmatpush2.msra.mxu0 %v1138_v42  ;;  %1336 = vmatpush1.msra.mxu1 %v709_v55 }
 0x27d   :  { %1299 = vmatmul.mubr.f32.vlgmr.msra.gmra.mxu0 %v661_v32  ;;  %1365 = vmatprep.subr.mxu1 %v1145_v48 }
 0x27e   :  { %1366 = vmatpush2.msra.mxu1 %v1144_v12  ;;  %1659 = vmatprep.mubr.f32.mxu0 %v3220_v5 }
 0x27f   :  { %1367 = vmatprep.subr.mxu1 %v1141_v11 }
 0x280   :  { %1368 = vmatpush2.msra.mxu1 %v1140_v23 }
 0x281   :  { %1370 = vmatmul.mubr.f32.vlgmr.msra.gmra.mxu1 %v661_v32 }
 0x282   :  { %1730 = vmatprep.mubr.f32.mxu1 %v3220_v5 }
 0x283   :  { %v1229_v45 = vpop.permute.xlu1 %1228 }
 0x33d   :  { %v1300_v40 = vpop.f32.mrf.mxu0 }
 0x33e   :  { %v1301_v16 = vadd.f32 %v1300_v40, %v1229_v45 }
 0x33f   :  { %v1302_v39 = vpop.f32.mrf.mxu0 }
 0x340   :  { %v2942_v58 = vmax.f32 %v1301_v16, 0.0  ;;  %v1303_v36 = vadd.f32 %v1302_v39, %v1229_v45 }
 0x341   :  { %v1371_v18 = vpop.f32.mrf.mxu1 }
 0x342   :  { %v1372_v13 = vadd.f32 %v1371_v18, %v1229_v45  ;;  %1530 = vrot.lane.b32.xlu0 %v2942_v58, %s1832_s3  ;;  %v2964_v33 = vmax.f32 %v1303_v36, 0.0 }
 0x343   :  { %v1373_v41 = vpop.f32.mrf.mxu1 }
 0x344   :  { %v2946_v21 = vmax.f32 %v1372_v13, 0.0  ;;  %v1374_v14 = vadd.f32 %v1373_v41, %v1229_v45 }
 0x346   :  { %1534 = vrot.lane.b32.xlu1 %v2946_v21, %s1832_s3  ;;  %1514 = vrot.lane.b32.xlu0 %v2946_v21, %s1825_s0  ;;  %v2974_v29 = vmax.f32 %v1374_v14, 0.0 }
 0x34a   :  { %1510 = vrot.lane.b32.xlu1 %v2942_v58, %s1825_s0  ;;  %1402 = vrot.lane.b32.xlu0 %v2942_v58, %s1830_s22 }
 0x34e   :  { %1494 = vrot.lane.b32.xlu1 %v2946_v21, %s1826_s29  ;;  %1446 = vrot.lane.b32.xlu0 %v2946_v21, %s1828_s1 }
 0x352   :  { %1490 = vrot.lane.b32.xlu1 %v2942_v58, %s1826_s29  ;;  %1382 = vrot.lane.b32.xlu0 %v2942_v58, %s1831_s23 }
 0x356   :  { %1474 = vrot.lane.b32.xlu1 %v2946_v21, %s1827_s30  ;;  %1532 = vrot.lane.b32.xlu0 %v2964_v33, %s1832_s3 }
 0x35a   :  { %1470 = vrot.lane.b32.xlu1 %v2942_v58, %s1827_s30  ;;  %1492 = vrot.lane.b32.xlu0 %v2964_v33, %s1826_s29 }
 0x35e   :  { %1442 = vrot.lane.b32.xlu1 %v2942_v58, %s1828_s1  ;;  %1536 = vrot.lane.b32.xlu0 %v2974_v29, %s1832_s3 }
 0x362   :  { %1422 = vrot.lane.b32.xlu1 %v2942_v58, %s1829_s14  ;;  %1472 = vrot.lane.b32.xlu0 %v2964_v33, %s1827_s30 }
 0x366   :  { %1512 = vrot.lane.b32.xlu1 %v2964_v33, %s1825_s0  ;;  %1516 = vrot.lane.b32.xlu0 %v2974_v29, %s1825_s0 }
 0x36a   :  { %1476 = vrot.lane.b32.xlu1 %v2974_v29, %s1827_s30  ;;  %1496 = vrot.lane.b32.xlu0 %v2974_v29, %s1826_s29 }
 0x36e   :  { %1428 = vrot.lane.b32.xlu1 %v2974_v29, %s1829_s14  ;;  %1444 = vrot.lane.b32.xlu0 %v2964_v33, %s1828_s1 }
 0x372   :  { %1404 = vrot.lane.b32.xlu1 %v2964_v33, %s1830_s22  ;;  %1448 = vrot.lane.b32.xlu0 %v2974_v29, %s1828_s1 }
 0x376   :  { %1408 = vrot.lane.b32.xlu1 %v2974_v29, %s1830_s22  ;;  %1424 = vrot.lane.b32.xlu0 %v2964_v33, %s1829_s14 }
 0x37a   :  { %1384 = vrot.lane.b32.xlu1 %v2964_v33, %s1831_s23  ;;  %1426 = vrot.lane.b32.xlu0 %v2946_v21, %s1829_s14 }
 0x37e   :  { %1388 = vrot.lane.b32.xlu1 %v2974_v29, %s1831_s23  ;;  %1406 = vrot.lane.b32.xlu0 %v2946_v21, %s1830_s22 }
 0x382   :  { %1386 = vrot.lane.b32.xlu1 %v2946_v21, %s1831_s23  ;;  %1588 = vperm.xlu0 %1819, %v1381_v37  }
 0x3b4   :  { %v1531_v27 = vpop.permute.xlu0 %1530 }
 0x3b8   :  { %v1535_v8 = vpop.permute.xlu1 %1534  ;;  %v1515_v47 = vpop.permute.xlu0 %1514 }
 0x3bc   :  { %v1511_v22 = vpop.permute.xlu1 %1510  ;;  %v3017_v59 = vpop.permute.xlu0 %1402 }
 0x3c0   :  { %v1495_v49 = vpop.permute.xlu1 %1494  ;;  %v3019_v63 = vpop.permute.xlu0 %1446 }
 0x3c4   :  { %v1491_v2 = vpop.permute.xlu1 %1490  ;;  %v3021_v15 = vpop.permute.xlu0 %1382 }
 0x3c8   :  { %v1475_v42 = vpop.permute.xlu1 %1474  ;;  %v1533_v44 = vpop.permute.xlu0 %1532 }
 0x3c9   :  { %v1539_v24 = vsel %vm1113_vm8, %v1533_v44, %v1535_v8  ;;  %v1540_v51 = vsel %vm1113_vm8, %v1531_v27, %v1533_v44 }
 0x3ca   :  { %v1542_v55 = vmul.f32 %v2843_v6, %v1540_v51  ;;  %v1543_v30 = vmul.f32 %v2884_v46, %v1539_v24 }
 0x3cc   :  { %v1471_v17 = vpop.permute.xlu1 %1470  ;;  %1609 = vmatprep.subr.mxu0 %v1543_v30  ;;  %v1493_v32 = vpop.permute.xlu0 %1492 }
 0x3cd   :  { %1610 = vmatpush1.msra.mxu0 %v1542_v55  ;;  %v1499_v40 = vsel %vm999_vm2, %v1493_v32, %v1495_v49  ;;  %v3222_v55 = vld [vmem:[#allocation18_spill] sm:$0xff] }
 0x3d0   :  { %v3029_v48 = vpop.permute.xlu1 %1442  ;;  %v1537_v11 = vpop.permute.xlu0 %1536 }
 0x3d1   :  { %v1538_v12 = vsel %vm1113_vm8, %v1535_v8, %v1537_v11  ;;  %v1541_v23 = vsel %vm1113_vm8, %v1537_v11, %v1531_v27  ;;  %v1500_v27 = vsel %vm999_vm2, %v1491_v2, %v1493_v32  ;;  %v1503_v8 = vmul.f32 %v1499_v40, %v2560_v26  ;;  %v3221_v26 = vld [vmem:[#allocation16_spill] sm:$0xff]  ;;  %v3223_v32 = vld [vmem:[#allocation17_spill] sm:$0xff]  ;;  %v3227_v40 = vld [vmem:[#allocation22_spill] sm:$0xff] }
 0x3d2   :  { %v1544_v5 = vmul.f32 %v2922_v56, %v1538_v12  ;;  %v1545_v45 = vmul.f32 %v2912_v1, %v1541_v23  ;;  %v1502_v24 = vmul.f32 %v1500_v27, %v3221_v26  ;;  %v3224_v12 = vld [vmem:[#allocation19_spill] sm:$0xff] }
 0x3d4   :  { %v3037_v6 = vpop.permute.xlu1 %1422  ;;  %1680 = vmatprep.subr.mxu1 %v1545_v45  ;;  %v1473_v46 = vpop.permute.xlu0 %1472 }
 0x3d5   :  { %1681 = vmatpush1.msra.mxu1 %v1544_v5  ;;  %v1479_v44 = vsel %vm942_vm3, %v1473_v46, %v1475_v42 }
 0x3d6   :  { %v1483_v23 = vmul.f32 %v1479_v44, %v3224_v12 }
 0x3d8   :  { %v1513_v16 = vpop.permute.xlu1 %1512  ;;  %v1517_v18 = vpop.permute.xlu0 %1516 }
 0x3d9   :  { %v1519_v13 = vsel %vm1056_vm1, %v1513_v16, %v1515_v47  ;;  %v1520_v39 = vsel %vm1056_vm1, %v1511_v22, %v1513_v16  ;;  %v1518_v56 = vsel %vm1056_vm1, %v1515_v47, %v1517_v18  ;;  %v1521_v1 = vsel %vm1056_vm1, %v1517_v18, %v1511_v22  ;;  %v3228_v18 = vld [vmem:[#allocation24_spill] sm:$0xff] }
 0x3da   :  { %v1522_v36 = vmul.f32 %v1520_v39, %v2232_v31  ;;  %v1523_v41 = vmul.f32 %v1519_v13, %v2263_v43  ;;  %v1524_v14 = vmul.f32 %v1518_v56, %v2249_v38  ;;  %v1525_v37 = vmul.f32 %v1521_v1, %v2241_v35  ;;  %v3229_v56 = vld [vmem:[#allocation23_spill] sm:$0xff] }
 0x3db   :  { %v1480_v31 = vsel %vm942_vm3, %v1471_v17, %v1473_v46  ;;  %v1463_v13 = vmul.f32 %v2964_v33, %v3228_v18  ;;  %v1462_v1 = vmul.f32 %v2942_v58, %v3229_v56 }
 0x3dc   :  { %v1477_v47 = vpop.permute.xlu1 %1476  ;;  %1611 = vmatprep.subr.mxu0 %v1523_v41  ;;  %1682 = vmatprep.subr.mxu1 %v1525_v37  ;;  %v1497_v22 = vpop.permute.xlu0 %1496  ;;  %v1464_v41 = vmul.f32 %v2946_v21, %v2652_v60 }
 0x3dd   :  { %v1481_v38 = vsel %vm942_vm3, %v1477_v47, %v1471_v17  ;;  %v1498_v35 = vsel %vm999_vm2, %v1495_v49, %v1497_v22  ;;  %v1501_v43 = vsel %vm999_vm2, %v1497_v22, %v1491_v2  ;;  %1612 = vmatpush1.msra.mxu0 %v1522_v36  ;;  %v1478_v51 = vsel %vm942_vm3, %v1475_v42, %v1477_v47  ;;  %v3225_v17 = vld [vmem:[#allocation20_spill] sm:$0xff]  ;;  %v3226_v49 = vld [vmem:[#allocation21_spill] sm:$0xff] }
 0x3de   :  { %v1504_v30 = vmul.f32 %v1498_v35, %v3222_v55  ;;  %v1505_v11 = vmul.f32 %v1501_v43, %v3223_v32  ;;  %1683 = vmatpush1.msra.mxu1 %v1524_v14  ;;  %1613 = vmatprep.subr.mxu0 %v1503_v8  ;;  %v1482_v5 = vmul.f32 %v1480_v31, %v3225_v17 }
 0x3df   :  { %v1485_v45 = vmul.f32 %v1481_v38, %v3226_v49  ;;  %1614 = vmatpush1.msra.mxu0 %v1502_v24  ;;  %v1484_v16 = vmul.f32 %v1478_v51, %v3227_v40  ;;  %v1465_v36 = vmul.f32 %v2974_v29, %v2648_v54  ;;  %v1380_v51 = vld [vmem:[%s3172_s9] sm:$0xff] }
 0x3e0   :  { %v1429_v2 = vpop.permute.xlu1 %1428  ;;  %1684 = vmatprep.subr.mxu1 %v1505_v11  ;;  %v1445_v46 = vpop.permute.xlu0 %1444  ;;  %1615 = vmatprep.subr.mxu0 %v1483_v23 }
 0x3e1   :  { %v1452_v42 = vsel %vm853_vm4, %v3029_v48, %v1445_v46  ;;  %1685 = vmatpush1.msra.mxu1 %v1504_v30  ;;  %1616 = vmatpush1.msra.mxu0 %v1482_v5  ;;  %v1451_v14 = vsel %vm853_vm4, %v1445_v46, %v3019_v63  ;;  %v1433_v37 = vsel %vm796_vm5, %v1429_v2, %v3037_v6 }
 0x3e2   :  { %v1455_v39 = vmul.f32 %v1452_v42, %v2658_v62  ;;  %1686 = vmatprep.subr.mxu1 %v1485_v45  ;;  %1617 = vmatprep.subr.mxu0 %v1463_v13  ;;  %v1456_v29 = vmul.f32 %v1451_v14, %v2676_v57 }
 0x3e3   :  { %1687 = vmatpush1.msra.mxu1 %v1484_v16  ;;  %1618 = vmatpush1.msra.mxu0 %v1462_v1 }
 0x3e4   :  { %v1405_v33 = vpop.permute.xlu1 %1404  ;;  %1688 = vmatprep.subr.mxu1 %v1465_v36  ;;  %v1449_v62 = vpop.permute.xlu0 %1448  ;;  %1619 = vmatprep.subr.mxu0 %v1455_v39 }
 0x3e5   :  { %v1450_v58 = vsel %vm853_vm4, %v3019_v63, %v1449_v62  ;;  %v1453_v54 = vsel %vm853_vm4, %v1449_v62, %v3029_v48  ;;  %1689 = vmatpush1.msra.mxu1 %v1464_v41  ;;  %v1412_v63 = vsel %vm739_vm6, %v3017_v59, %v1405_v33  ;;  %v1434_v48 = vmul.f32 %v1433_v37, %v2690_v3 }
 0x3e6   :  { %v1454_v60 = vmul.f32 %v1453_v54, %v2668_v10  ;;  %v1457_v21 = vmul.f32 %v1450_v58, %v2680_v34  ;;  %v1415_v44 = vmul.f32 %v1412_v63, %v2702_v53 }
 0x3e8   :  { %v1409_v27 = vpop.permute.xlu1 %1408  ;;  %1690 = vmatprep.subr.mxu1 %v1457_v21  ;;  %v1425_v8 = vpop.permute.xlu0 %1424  ;;  %1620 = vmatpush1.msra.mxu0 %v1454_v60 }
 0x3e9   :  { %v1432_v10 = vsel %vm796_vm5, %v3037_v6, %v1425_v8  ;;  %1691 = vmatpush1.msra.mxu1 %v1456_v29  ;;  %v1413_v57 = vsel %vm739_vm6, %v1409_v27, %v3017_v59 }
 0x3ea   :  { %v1435_v34 = vmul.f32 %v1432_v10, %v2684_v19  ;;  %v1414_v31 = vmul.f32 %v1413_v57, %v2708_v50 }
 0x3ec   :  { %v1385_v47 = vpop.permute.xlu1 %1384  ;;  %v1427_v22 = vpop.permute.xlu0 %1426  ;;  %1621 = vmatprep.subr.mxu0 %v1435_v34 }
 0x3ed   :  { %v1392_v6 = vsel %vm682_vm7, %v3021_v15, %v1385_v47  ;;  %v1430_v38 = vsel %vm796_vm5, %v1427_v22, %v1429_v2  ;;  %v1431_v59 = vsel %vm796_vm5, %v1425_v8, %v1427_v22  ;;  %1622 = vmatpush1.msra.mxu0 %v1434_v48 }
 0x3ee   :  { %v1395_v19 = vmul.f32 %v1392_v6, %v2730_v20  ;;  %v1436_v3 = vmul.f32 %v1431_v59, %v2694_v7  ;;  %v1437_v53 = vmul.f32 %v1430_v38, %v2698_v52  ;;  %1623 = vmatprep.subr.mxu0 %v1415_v44 }
 0x3ef   :  { %1624 = vmatpush1.msra.mxu0 %v1414_v31 }
 0x3f0   :  { %v1389_v50 = vpop.permute.xlu1 %1388  ;;  %1692 = vmatprep.subr.mxu1 %v1437_v53  ;;  %v1407_v35 = vpop.permute.xlu0 %1406  ;;  %1625 = vmatprep.subr.mxu0 %v1395_v19 }
 0x3f1   :  { %v1393_v43 = vsel %vm682_vm7, %v1389_v50, %v3021_v15  ;;  %v1410_v26 = vsel %vm739_vm6, %v1407_v35, %v1409_v27  ;;  %v1411_v20 = vsel %vm739_vm6, %v1405_v33, %v1407_v35  ;;  %1693 = vmatpush1.msra.mxu1 %v1436_v3  ;;  %v1764_v27 = vld [vmem:[%s3174_s11] sm:$0xff] }
 0x3f2   :  { %v1394_v7 = vmul.f32 %v1393_v43, %v2734_v25  ;;  %v1416_v52 = vmul.f32 %v1411_v20, %v2712_v0  ;;  %v1417_v24 = vmul.f32 %v1410_v26, %v2722_v61 }
 0x3f4   :  { %v1387_v55 = vpop.permute.xlu1 %1386  ;;  %1626 = vmatpush1.msra.mxu0 %v1394_v7  ;;  %1694 = vmatprep.subr.mxu1 %v1417_v24 }
 0x3f5   :  { %v1390_v15 = vsel %vm682_vm7, %v1387_v55, %v1389_v50  ;;  %v1391_v30 = vsel %vm682_vm7, %v1385_v47, %v1387_v55  ;;  %1807 = vmatmul.mubr.msk.f32.vlgmr.msra.gmra.mxu0 %vm1591_vm9, %v1380_v51  ;;  %1695 = vmatpush1.msra.mxu1 %v1416_v52 }
 0x3f6   :  { %v1396_v0 = vmul.f32 %v1391_v30, %v2874_v9  ;;  %v1397_v61 = vmul.f32 %v1390_v15, %v2835_v4  ;;  %v1775_v4 = vld [vmem:[%s3173_s12] sm:$0xff] }
 0x3f8   :  { %1696 = vmatprep.subr.mxu1 %v1397_v61 }
 0x3f9   :  { %1697 = vmatpush1.msra.mxu1 %v1396_v0 }
 0x3fa   :  { %1808 = vmatmul.mubr.msk.f32.vlgmr.msra.gmra.mxu1 %vm1591_vm9, %v1380_v51 }
 0x3fd   :  { %v1589_v25 = vpop.permute.xlu0 %1588 }
 0x4b5   :  { %v1661_v32 = vpop.f32.mrf.mxu0 }
 0x4b6   :  { %v1662_v11 = vadd.f32 %v1661_v32, %v1589_v25 }
 0x4b7   :  { %v1663_v12 = vpop.f32.mrf.mxu0 }
 0x4b8   :  { %v1664_v23 = vadd.f32 %v1663_v12, %v1589_v25  ;;  %v1737_v17 = vmax.f32 %v1662_v11, 0.0 }
 0x4ba   :  { %v1738_v5 = vmax.f32 %v1664_v23, 0.0  ;;  %v1732_v49 = vpop.f32.mrf.mxu1 }
 0x4bb   :  { %v1733_v45 = vadd.f32 %v1732_v49, %v1589_v25 }
 0x4bc   :  { %v1741_v28 = vadd.f32 %v1738_v5, %v1737_v17  ;;  %v1734_v2 = vpop.f32.mrf.mxu1 }
 0x4bd   :  { %v1739_v46 = vmax.f32 %v1733_v45, 0.0  ;;  %v1735_v40 = vadd.f32 %v1734_v2, %v1589_v25 }
 0x4bf   :  { %v1742_v16 = vadd.f32 %v1741_v28, %v1739_v46  ;;  %v1740_v9 = vmax.f32 %v1735_v40, 0.0 }
 0x4c1   :  { %v1743_v42 = vadd.f32 %v1742_v16, %v1740_v9 }
 0x4c3   :  { %1744 = vadd.xlane.f32.xlu1 %v1743_v42 }
 0x4d4   :  { %1778 = vperm.xlu1 %1820, %v1775_v4  }
 0x54c   :  { %v1745_v18 = vpop.xlane.xlu1 %1744 }
 0x54d   :  { %v1747_v13 = vmul.f32 0.001953125, %v1745_v18 }
 0x54f   :  { %v1748_v39 = vsub.f32 %v1737_v17, %v1747_v13  ;;  %v1749_v56 = vsub.f32 %v1738_v5, %v1747_v13  ;;  %v1750_v1 = vsub.f32 %v1739_v46, %v1747_v13  ;;  %v1751_v36 = vsub.f32 %v1740_v9, %v1747_v13 }
 0x550   :  { %v1779_v47 = vpop.permute.xlu1 %1778 }
 0x551   :  { %v1752_v41 = vmul.f32 %v1748_v39, %v1748_v39  ;;  %v1753_v14 = vmul.f32 %v1749_v56, %v1749_v56  ;;  %v1754_v33 = vmul.f32 %v1750_v1, %v1750_v1  ;;  %v1755_v58 = vmul.f32 %v1751_v36, %v1751_v36 }
 0x553   :  { %v1756_v62 = vadd.f32 %v1753_v14, %v1752_v41 }
 0x555   :  { %v1757_v54 = vadd.f32 %v1756_v62, %v1754_v33 }
 0x557   :  { %v1758_v60 = vadd.f32 %v1757_v54, %v1755_v58 }
 0x559   :  { %1759 = vadd.xlane.f32.xlu0 %v1758_v60 }
 0x5e2   :  { %v1760_v21 = vpop.xlane.xlu0 %1759 }
 0x5e3   :  { %v1761_v29 = vmul.f32 0.001953125, %v1760_v21 }
 0x5e5   :  { %v1762_v37 = vadd.f32 1e-05, %v1761_v29 }
 0x5e7   :  { %1821 = vrsqrt.f32 %v1762_v37 }
 0x5f4   :  { %v1822_v8 = vpop.eup %1821 }
 0x5f5   :  { %v1765_v63 = vmul.f32 %v1822_v8, %v1764_v27 }
 0x5f7   :  { %1768 = vperm.xlu0 %1819, %v1765_v63  }
 0x672   :  { %v1769_v10 = vpop.permute.xlu0 %1768 }
 0x673   :  { %v1771_v57 = vmul.f32 %v1769_v10, %v1748_v39  ;;  %v1772_v34 = vmul.f32 %v1769_v10, %v1749_v56  ;;  %v1773_v48 = vmul.f32 %v1769_v10, %v1750_v1  ;;  %v1774_v44 = vmul.f32 %v1769_v10, %v1751_v36 }
 0x675   :  { %v1781_v22 = vadd.f32 %v1779_v47, %v1771_v57  ;;  %v1782_v31 = vadd.f32 %v1779_v47, %v1772_v34  ;;  %v1783_v6 = vadd.f32 %v1779_v47, %v1773_v48  ;;  %v1784_v38 = vadd.f32 %v1779_v47, %v1774_v44 }
 0x677   :  { %1785 = vst [vmem:[%s3175_s13] sm:$0xff] %v1781_v22  ;;  %1786 = vst [vmem:[%s3175_s13 + $0x8] sm:$0xff] %v1782_v31 }
 0x678   :  { %1787 = vst [vmem:[%s3175_s13 + $0x10] sm:$0xff] %v1783_v6  ;;  %1788 = vst [vmem:[%s3175_s13 + $0x18] sm:$0xff] %v1784_v38 }

</bundles_post_ra>
